<compile_context>
chip_gen: v7x
topology: tpu7x:2x2x1
jax: 0.10.0
libtpu: 0.0.40
codegen_flags: <defaults>
</compile_context>

<pallas_src>
import math
import functools

import jax
import jax.numpy as jnp
from jax.experimental import pallas as pl
from jax.experimental.pallas import tpu as pltpu


def _cross_attn_kernel(img_ref, txt_ref,
                       wq_ref, wk_ref, wv_ref, wo_ref,
                       bq_ref, bk_ref, bv_ref, bo_ref,
                       lnw_ref, lnb_ref,
                       out_ref,
                       kh_ref, vh_ref,
                       *, num_heads: int, eps: float):
    Tq, D = img_ref.shape                    # query tile
    Lk = txt_ref.shape[0]                    # full key/value length
    dh = D // num_heads

    # ---- K/V projection + head transpose: once per batch element, cached in
    #      VMEM scratch and reused for every query tile of that batch element.
    @pl.when(pl.program_id(1) == 0)
    def _():
        txt_bf = txt_ref[...].astype(jnp.bfloat16)
        k = jnp.dot(txt_bf, wk_ref[...], preferred_element_type=jnp.float32) + bk_ref[...]
        v = jnp.dot(txt_bf, wv_ref[...], preferred_element_type=jnp.float32) + bv_ref[...]
        # (Lk, D) --T--> (D, Lk) --sublane split--> (H, dh, Lk): the 128-lane
        # (minor) dim is never split.
        kh_ref[...] = k.T.reshape(num_heads, dh, Lk).astype(jnp.bfloat16)
        vh_ref[...] = v.T.reshape(num_heads, dh, Lk).astype(jnp.bfloat16)

    img = img_ref[...]                        # (Tq, D) f32 (kept for residual)
    img_bf = img.astype(jnp.bfloat16)

    # ---- Q projection (1/sqrt(dh) already folded into Wq / bq on the host).
    q = jnp.dot(img_bf, wq_ref[...], preferred_element_type=jnp.float32) + bq_ref[...]
    qh = jnp.swapaxes(q.T.reshape(num_heads, dh, Tq), 1, 2).astype(jnp.bfloat16)  # (H,Tq,dh)

    kh = kh_ref[...]                          # (H, dh, Lk) bf16
    vh = vh_ref[...]                          # (H, dh, Lk) bf16

    # ---- Attention scores: ONE batched matmul over all heads.
    s = jnp.einsum("hqd,hdk->hqk", qh, kh, preferred_element_type=jnp.float32)

    # Numerically stable softmax in f32; divide via EUP approx reciprocal.
    s = s - jnp.max(s, axis=-1, keepdims=True)
    p = jnp.exp(s)
    p = p * pl.reciprocal(jnp.sum(p, axis=-1, keepdims=True), approx=True)

    # ---- Context: ONE batched matmul, contracting over Lk (transposed rhs).
    ctx = jnp.einsum("hqk,hdk->hqd", p.astype(jnp.bfloat16), vh,
                     preferred_element_type=jnp.float32)          # (H, Tq, dh)

    # Merge heads: (H, Tq, dh) -> (H, dh, Tq) -> (D, Tq) -> (Tq, D)
    ctx = jnp.swapaxes(ctx, 1, 2).reshape(D, Tq).T

    # ---- Output projection + residual.
    attn = jnp.dot(ctx.astype(jnp.bfloat16), wo_ref[...],
                   preferred_element_type=jnp.float32) + bo_ref[...]
    res = attn + img

    # ---- LayerNorm over the feature dim (biased variance, like torch), in f32.
    mean = jnp.mean(res, axis=-1, keepdims=True)
    var = jnp.mean((res - mean) ** 2, axis=-1, keepdims=True)
    normed = (res - mean) * jax.lax.rsqrt(var + eps)
    out_ref[...] = (normed * lnw_ref[...] + lnb_ref[...]).astype(out_ref.dtype)


def cross_attention(img, txt, params, *, num_heads: int, eps: float = 1e-5,
                    q_tile: int = 128):
    B, Lq, D = img.shape
    _, Lk, _ = txt.shape
    assert D % num_heads == 0, "feature_dim must be divisible by num_heads"
    dh = D // num_heads
    scale = 1.0 / math.sqrt(dh)

    tq = Lq if Lq <= q_tile else q_tile
    assert Lq % tq == 0, "Lq must be divisible by the query tile size"
    n_qt = Lq // tq

    kernel = functools.partial(_cross_attn_kernel, num_heads=num_heads, eps=eps)

    # Grid-invariant parameters: single resident copy in VMEM (no pipelining /
    # double buffering of the (D, D) weights).
    resident = pl.BlockSpec(memory_space=pltpu.MemorySpace.VMEM)

    # bf16 weights: halve HBM traffic + VMEM residency, feed the MXU directly.
    # Fold the attention scale into Wq / bq so no per-element scale is needed
    # inside the kernel.
    wq = (params["wq"] * scale).astype(jnp.bfloat16)
    bq = params["bq"] * scale
    wk = params["wk"].astype(jnp.bfloat16)
    wv = params["wv"].astype(jnp.bfloat16)
    wo = params["wo"].astype(jnp.bfloat16)

    # Rough cost hint for the XLA scheduler.
    flops = int(2 * B * D * D * (2 * Lq + 2 * Lk) + 4 * B * Lq * Lk * D)
    transcendentals = int(B * num_heads * Lq * Lk)
    bytes_accessed = int(4 * (2 * B * Lq * D + B * Lk * D) + 2 * 4 * D * D + 4 * 6 * D)

    # Large feature dims need a larger scoped-VMEM budget for the resident
    # weights (cap lower on v7x where physical VMEM is 64 MiB per core).
    vmem_limit = (64 * 1024 * 1024) if D >= 1024 else None

    return pl.pallas_call(
        kernel,
        out_shape=jax.ShapeDtypeStruct((B, Lq, D), jnp.float32),
        grid_spec=pltpu.PrefetchScalarGridSpec(
            num_scalar_prefetch=0,
            grid=(B, n_qt),
            in_specs=[
                pl.BlockSpec((None, tq, D), lambda b, t: (b, t, 0)),   # img (query)
                pl.BlockSpec((None, Lk, D), lambda b, t: (b, 0, 0)),   # txt (key/value)
                resident, resident, resident, resident,                # Wq Wk Wv Wo
                resident, resident, resident, resident,                # bq bk bv bo
                resident, resident,                                    # ln_w ln_b
            ],
            out_specs=pl.BlockSpec((None, tq, D), lambda b, t: (b, t, 0)),
            scratch_shapes=[
                pltpu.VMEM((num_heads, dh, Lk), jnp.bfloat16),         # cached K (per-head)
                pltpu.VMEM((num_heads, dh, Lk), jnp.bfloat16),         # cached V (per-head)
            ],
        ),
        compiler_params=pltpu.CompilerParams(
            # Query-tile axis carries the K/V scratch cache -> sequential.
            dimension_semantics=("parallel", "arbitrary"),
            vmem_limit_bytes=vmem_limit),
        cost_estimate=pl.CostEstimate(flops=flops,
                                      transcendentals=transcendentals,
                                      bytes_accessed=bytes_accessed),
    )(img, txt, wq, wk, wv, wo,
      bq, params["bk"], params["bv"], params["bo"],
      params["ln_w"], params["ln_b"])


def cross_attention_ref(img, txt, params, *, num_heads: int, eps: float = 1e-5):
    """Pure-JAX f32 reference mirroring nn.MultiheadAttention + LayerNorm."""
    B, Lq, D = img.shape
    Lk = txt.shape[1]
    dh = D // num_heads
    scale = 1.0 / math.sqrt(dh)

    q = img @ params["wq"] + params["bq"]
    k = txt @ params["wk"] + params["bk"]
    v = txt @ params["wv"] + params["bv"]

    q = q.reshape(B, Lq, num_heads, dh).transpose(0, 2, 1, 3)
    k = k.reshape(B, Lk, num_heads, dh).transpose(0, 2, 1, 3)
    v = v.reshape(B, Lk, num_heads, dh).transpose(0, 2, 1, 3)

    s = jnp.einsum("bhqd,bhkd->bhqk", q, k) * scale
    p = jax.nn.softmax(s, axis=-1)
    ctx = jnp.einsum("bhqk,bhkd->bhqd", p, v)
    ctx = ctx.transpose(0, 2, 1, 3).reshape(B, Lq, D)

    attn_out = ctx @ params["wo"] + params["bo"]
    res = attn_out + img
    mean = jnp.mean(res, axis=-1, keepdims=True)
    var = jnp.mean((res - mean) ** 2, axis=-1, keepdims=True)
    return (res - mean) / jnp.sqrt(var + eps) * params["ln_w"] + params["ln_b"]


def init_params(key, feature_dim):
    """Deterministic synthetic parameters. Projection weights are stored
    pre-transposed so that y = x @ W + b (matches nn.MultiheadAttention math)."""
    ks = jax.random.split(key, 10)
    lim = 1.0 / math.sqrt(feature_dim)
    w = lambda k: jax.random.uniform(k, (feature_dim, feature_dim),
                                     jnp.float32, -lim, lim)
    b = lambda k: jax.random.uniform(k, (1, feature_dim), jnp.float32, -lim, lim)
    return {
        "wq": w(ks[0]), "wk": w(ks[1]), "wv": w(ks[2]), "wo": w(ks[3]),
        "bq": b(ks[4]), "bk": b(ks[5]), "bv": b(ks[6]), "bo": b(ks[7]),
        "ln_w": 1.0 + 0.1 * jax.random.uniform(ks[8], (1, feature_dim),
                                               jnp.float32, -1.0, 1.0),
        "ln_b": 0.1 * jax.random.uniform(ks[9], (1, feature_dim),
                                         jnp.float32, -1.0, 1.0),
    }


if __name__ == "__main__":
    # Lane-dense feature dim (multiple of 128); num_heads=8 matches module default.
    B, Lq, Lk, D, H = 2, 16, 32, 128, 8

    key = jax.random.PRNGKey(0)
    k_img, k_txt, k_param = jax.random.split(key, 3)
    img = jax.random.normal(k_img, (B, Lq, D), jnp.float32)
    txt = jax.random.normal(k_txt, (B, Lk, D), jnp.float32)
    params = init_params(k_param, D)

    out = cross_attention(img, txt, params, num_heads=H)
    out = jax.block_until_ready(out)

    ref = cross_attention_ref(img, txt, params, num_heads=H)
    assert out.shape == (B, Lq, D)
    max_err = float(jnp.max(jnp.abs(out - ref)))
    # Tolerance accounts for bf16 MXU operands + approx reciprocal (f32 stats kept).
    assert jnp.allclose(out, ref, atol=3e-2, rtol=3e-2), \
        f"mismatch vs reference (max abs err = {max_err})"

    print("KERNEL_OK")
</pallas_src>

<mosaic_0001>
module attributes {stable_mosaic.version = 11 : i64} {
  func.func @_cross_attn_kernel(%arg0: i32, %arg1: i32, %arg2: memref<1x16x128xf32, #tpu.memory_space<vmem>>, %arg3: memref<1x32x128xf32, #tpu.memory_space<vmem>>, %arg4: memref<128x128xbf16, #tpu.memory_space<vmem>>, %arg5: memref<128x128xbf16, #tpu.memory_space<vmem>>, %arg6: memref<128x128xbf16, #tpu.memory_space<vmem>>, %arg7: memref<128x128xbf16, #tpu.memory_space<vmem>>, %arg8: memref<1x128xf32, #tpu.memory_space<vmem>>, %arg9: memref<1x128xf32, #tpu.memory_space<vmem>>, %arg10: memref<1x128xf32, #tpu.memory_space<vmem>>, %arg11: memref<1x128xf32, #tpu.memory_space<vmem>>, %arg12: memref<1x128xf32, #tpu.memory_space<vmem>>, %arg13: memref<1x128xf32, #tpu.memory_space<vmem>>, %arg14: memref<1x16x128xf32, #tpu.memory_space<vmem>>, %arg15: memref<8x16x32xbf16, #tpu.memory_space<vmem>>, %arg16: memref<8x16x32xbf16, #tpu.memory_space<vmem>>) attributes {dimension_semantics = [#tpu.dimension_semantics<parallel>, #tpu.dimension_semantics<arbitrary>], iteration_bounds = array<i64: 2, 1>, scalar_prefetch = 0 : i64, scratch_operands = 2 : i64, tpu.core_type = #tpu.core_type<tc>, window_params = [{transform_indices = @transform_0, window_bounds = array<i64: 1, 16, 128>}, {transform_indices = @transform_1, window_bounds = array<i64: 1, 32, 128>}, {pipeline_mode = #tpu.pipeline_mode<synchronous>, transform_indices = @transform_2, window_bounds = array<i64: 128, 128>}, {pipeline_mode = #tpu.pipeline_mode<synchronous>, transform_indices = @transform_3, window_bounds = array<i64: 128, 128>}, {pipeline_mode = #tpu.pipeline_mode<synchronous>, transform_indices = @transform_4, window_bounds = array<i64: 128, 128>}, {pipeline_mode = #tpu.pipeline_mode<synchronous>, transform_indices = @transform_5, window_bounds = array<i64: 128, 128>}, {pipeline_mode = #tpu.pipeline_mode<synchronous>, transform_indices = @transform_6, window_bounds = array<i64: 1, 128>}, {pipeline_mode = #tpu.pipeline_mode<synchronous>, transform_indices = @transform_7, window_bounds = array<i64: 1, 128>}, {pipeline_mode = #tpu.pipeline_mode<synchronous>, transform_indices = @transform_8, window_bounds = array<i64: 1, 128>}, {pipeline_mode = #tpu.pipeline_mode<synchronous>, transform_indices = @transform_9, window_bounds = array<i64: 1, 128>}, {pipeline_mode = #tpu.pipeline_mode<synchronous>, transform_indices = @transform_10, window_bounds = array<i64: 1, 128>}, {pipeline_mode = #tpu.pipeline_mode<synchronous>, transform_indices = @transform_11, window_bounds = array<i64: 1, 128>}, {transform_indices = @transform_12, window_bounds = array<i64: 1, 16, 128>}]} {
    %c0_i32 = arith.constant 0 : i32
    %0 = arith.cmpi eq, %arg1, %c0_i32 : i32
    %1 = arith.extui %0 : i1 to i32
    %c0_i32_0 = arith.constant 0 : i32
    %2 = arith.cmpi ne, %1, %c0_i32_0 : i32
    scf.if %2 {
      %c0_34 = arith.constant 0 : index
      %c0_35 = arith.constant 0 : index
      %c0_36 = arith.constant 0 : index
      %67 = vector.load %arg3[%c0_34, %c0_35, %c0_36] : memref<1x32x128xf32, #tpu.memory_space<vmem>>, vector<1x32x128xf32>
      %68 = vector.shape_cast %67 : vector<1x32x128xf32> to vector<32x128xf32>
      %69 = arith.truncf %68 : vector<32x128xf32> to vector<32x128xbf16>
      %c0_37 = arith.constant 0 : index
      %c0_38 = arith.constant 0 : index
      %70 = vector.load %arg5[%c0_37, %c0_38] : memref<128x128xbf16, #tpu.memory_space<vmem>>, vector<128x128xbf16>
      %cst_39 = arith.constant dense<0.000000e+00> : vector<32x128xf32>
      %71 = tpu.matmul %69, %70, %cst_39 {dimension_numbers = #tpu.dot_dimension_numbers<[1], [0], [0], [1], [0, 0, 1, 1], [], []>} : vector<32x128xbf16>, vector<128x128xbf16>, vector<32x128xf32> -> vector<32x128xf32>
      %c0_40 = arith.constant 0 : index
      %c0_41 = arith.constant 0 : index
      %72 = vector.load %arg9[%c0_40, %c0_41] : memref<1x128xf32, #tpu.memory_space<vmem>>, vector<1x128xf32>
      %73 = vector.broadcast %72 : vector<1x128xf32> to vector<32x128xf32>
      %74 = arith.addf %71, %73 : vector<32x128xf32>
      %c0_42 = arith.constant 0 : index
      %c0_43 = arith.constant 0 : index
      %75 = vector.load %arg6[%c0_42, %c0_43] : memref<128x128xbf16, #tpu.memory_space<vmem>>, vector<128x128xbf16>
      %cst_44 = arith.constant dense<0.000000e+00> : vector<32x128xf32>
      %76 = tpu.matmul %69, %75, %cst_44 {dimension_numbers = #tpu.dot_dimension_numbers<[1], [0], [0], [1], [0, 0, 1, 1], [], []>} : vector<32x128xbf16>, vector<128x128xbf16>, vector<32x128xf32> -> vector<32x128xf32>
      %c0_45 = arith.constant 0 : index
      %c0_46 = arith.constant 0 : index
      %77 = vector.load %arg10[%c0_45, %c0_46] : memref<1x128xf32, #tpu.memory_space<vmem>>, vector<1x128xf32>
      %78 = vector.broadcast %77 : vector<1x128xf32> to vector<32x128xf32>
      %79 = arith.addf %76, %78 : vector<32x128xf32>
      %80 = tpu.transpose %74, [1, 0] : vector<32x128xf32> -> vector<128x32xf32>
      %81 = vector.shape_cast %80 : vector<128x32xf32> to vector<8x16x32xf32>
      %82 = arith.truncf %81 : vector<8x16x32xf32> to vector<8x16x32xbf16>
      %c0_47 = arith.constant 0 : index
      %c0_48 = arith.constant 0 : index
      %c0_49 = arith.constant 0 : index
      %83 = vector.load %arg15[%c0_47, %c0_48, %c0_49] : memref<8x16x32xbf16, #tpu.memory_space<vmem>>, vector<8x16x32xbf16>
      tpu.vector_store %arg15[%c0_47, %c0_48, %c0_49], %82 {strides = array<i32>} : memref<8x16x32xbf16, #tpu.memory_space<vmem>>, vector<8x16x32xbf16>,
      %84 = tpu.transpose %79, [1, 0] : vector<32x128xf32> -> vector<128x32xf32>
      %85 = vector.shape_cast %84 : vector<128x32xf32> to vector<8x16x32xf32>
      %86 = arith.truncf %85 : vector<8x16x32xf32> to vector<8x16x32xbf16>
      %c0_50 = arith.constant 0 : index
      %c0_51 = arith.constant 0 : index
      %c0_52 = arith.constant 0 : index
      %87 = vector.load %arg16[%c0_50, %c0_51, %c0_52] : memref<8x16x32xbf16, #tpu.memory_space<vmem>>, vector<8x16x32xbf16>
      tpu.vector_store %arg16[%c0_50, %c0_51, %c0_52], %86 {strides = array<i32>} : memref<8x16x32xbf16, #tpu.memory_space<vmem>>, vector<8x16x32xbf16>,
    } else {
    }
    %c0 = arith.constant 0 : index
    %c0_1 = arith.constant 0 : index
    %c0_2 = arith.constant 0 : index
    %3 = vector.load %arg2[%c0, %c0_1, %c0_2] : memref<1x16x128xf32, #tpu.memory_space<vmem>>, vector<1x16x128xf32>
    %4 = vector.shape_cast %3 : vector<1x16x128xf32> to vector<16x128xf32>
    %5 = arith.truncf %4 : vector<16x128xf32> to vector<16x128xbf16>
    %c0_3 = arith.constant 0 : index
    %c0_4 = arith.constant 0 : index
    %6 = vector.load %arg4[%c0_3, %c0_4] : memref<128x128xbf16, #tpu.memory_space<vmem>>, vector<128x128xbf16>
    %cst = arith.constant dense<0.000000e+00> : vector<16x128xf32>
    %7 = tpu.matmul %5, %6, %cst {dimension_numbers = #tpu.dot_dimension_numbers<[1], [0], [0], [1], [0, 0, 1, 1], [], []>} : vector<16x128xbf16>, vector<128x128xbf16>, vector<16x128xf32> -> vector<16x128xf32>
    %c0_5 = arith.constant 0 : index
    %c0_6 = arith.constant 0 : index
    %8 = vector.load %arg8[%c0_5, %c0_6] : memref<1x128xf32, #tpu.memory_space<vmem>>, vector<1x128xf32>
    %9 = vector.broadcast %8 : vector<1x128xf32> to vector<16x128xf32>
    %10 = arith.addf %7, %9 : vector<16x128xf32>
    %11 = tpu.transpose %10, [1, 0] : vector<16x128xf32> -> vector<128x16xf32>
    %12 = vector.shape_cast %11 : vector<128x16xf32> to vector<8x16x16xf32>
    %13 = tpu.transpose %12, [0, 2, 1] : vector<8x16x16xf32> -> vector<8x16x16xf32>
    %14 = arith.truncf %13 : vector<8x16x16xf32> to vector<8x16x16xbf16>
    %c0_7 = arith.constant 0 : index
    %c0_8 = arith.constant 0 : index
    %c0_9 = arith.constant 0 : index
    %15 = vector.load %arg15[%c0_7, %c0_8, %c0_9] : memref<8x16x32xbf16, #tpu.memory_space<vmem>>, vector<8x16x32xbf16>
    %c0_10 = arith.constant 0 : index
    %c0_11 = arith.constant 0 : index
    %c0_12 = arith.constant 0 : index
    %16 = vector.load %arg16[%c0_10, %c0_11, %c0_12] : memref<8x16x32xbf16, #tpu.memory_space<vmem>>, vector<8x16x32xbf16>
    "tpu.trace_start"() <{level = 10 : i32, message = "hqd,hdk->hqk"}> : () -> ()
    %cst_13 = arith.constant dense<0.000000e+00> : vector<8x16x32xf32>
    %17 = tpu.matmul %14, %15, %cst_13 {dimension_numbers = #tpu.dot_dimension_numbers<[2], [1], [1], [2], [0, 0, 0, 1, 1, 2], [0], [0]>} : vector<8x16x16xbf16>, vector<8x16x32xbf16>, vector<8x16x32xf32> -> vector<8x16x32xf32>
    "tpu.trace_stop"() : () -> ()
    %cst_14 = arith.constant dense<0xFF800000> : vector<8x16xf32>
    %18 = vector.multi_reduction <maximumf>, %17, %cst_14 [2] : vector<8x16x32xf32> to vector<8x16xf32>
    %19 = vector.shape_cast %18 : vector<8x16xf32> to vector<8x16x1xf32>
    %20 = vector.broadcast %19 : vector<8x16x1xf32> to vector<8x16x32xf32>
    %21 = arith.subf %17, %20 : vector<8x16x32xf32>
    %22 = math.exp %21 : vector<8x16x32xf32>
    %cst_15 = arith.constant dense<0.000000e+00> : vector<8x16xf32>
    %23 = vector.multi_reduction <add>, %22, %cst_15 [2] : vector<8x16x32xf32> to vector<8x16xf32>
    %24 = vector.shape_cast %23 : vector<8x16xf32> to vector<8x16x1xf32>
    %25 = tpu.reciprocal %24 {approx = true} : vector<8x16x1xf32> -> vector<8x16x1xf32>
    %26 = vector.broadcast %25 : vector<8x16x1xf32> to vector<8x16x32xf32>
    %27 = arith.mulf %22, %26 : vector<8x16x32xf32>
    %28 = arith.truncf %27 : vector<8x16x32xf32> to vector<8x16x32xbf16>
    "tpu.trace_start"() <{level = 10 : i32, message = "hqk,hdk->hqd"}> : () -> ()
    %cst_16 = arith.constant dense<0.000000e+00> : vector<8x16x16xf32>
    %29 = tpu.matmul %28, %16, %cst_16 {dimension_numbers = #tpu.dot_dimension_numbers<[2], [2], [1], [1], [0, 0, 0, 1, 1, 1], [0], [0]>} : vector<8x16x32xbf16>, vector<8x16x32xbf16>, vector<8x16x16xf32> -> vector<8x16x16xf32>
    "tpu.trace_stop"() : () -> ()
    %30 = tpu.transpose %29, [0, 2, 1] : vector<8x16x16xf32> -> vector<8x16x16xf32>
    %31 = vector.shape_cast %30 : vector<8x16x16xf32> to vector<128x16xf32>
    %32 = tpu.transpose %31, [1, 0] : vector<128x16xf32> -> vector<16x128xf32>
    %33 = arith.truncf %32 : vector<16x128xf32> to vector<16x128xbf16>
    %c0_17 = arith.constant 0 : index
    %c0_18 = arith.constant 0 : index
    %34 = vector.load %arg7[%c0_17, %c0_18] : memref<128x128xbf16, #tpu.memory_space<vmem>>, vector<128x128xbf16>
    %cst_19 = arith.constant dense<0.000000e+00> : vector<16x128xf32>
    %35 = tpu.matmul %33, %34, %cst_19 {dimension_numbers = #tpu.dot_dimension_numbers<[1], [0], [0], [1], [0, 0, 1, 1], [], []>} : vector<16x128xbf16>, vector<128x128xbf16>, vector<16x128xf32> -> vector<16x128xf32>
    %c0_20 = arith.constant 0 : index
    %c0_21 = arith.constant 0 : index
    %36 = vector.load %arg11[%c0_20, %c0_21] : memref<1x128xf32, #tpu.memory_space<vmem>>, vector<1x128xf32>
    %37 = vector.broadcast %36 : vector<1x128xf32> to vector<16x128xf32>
    %38 = arith.addf %35, %37 : vector<16x128xf32>
    %39 = arith.addf %38, %4 : vector<16x128xf32>
    %cst_22 = arith.constant dense<0.000000e+00> : vector<16xf32>
    %40 = vector.multi_reduction <add>, %39, %cst_22 [1] : vector<16x128xf32> to vector<16xf32>
    %41 = vector.shape_cast %40 : vector<16xf32> to vector<16x1xf32>
    %cst_23 = arith.constant 1.280000e+02 : f32
    %42 = vector.broadcast %cst_23 : f32 to vector<16x1xf32>
    %43 = arith.divf %41, %42 : vector<16x1xf32>
    %44 = vector.broadcast %43 : vector<16x1xf32> to vector<16x128xf32>
    %45 = arith.subf %39, %44 : vector<16x128xf32>
    %46 = arith.mulf %45, %45 : vector<16x128xf32>
    %cst_24 = arith.constant dense<0.000000e+00> : vector<16xf32>
    %47 = vector.multi_reduction <add>, %46, %cst_24 [1] : vector<16x128xf32> to vector<16xf32>
    %48 = vector.shape_cast %47 : vector<16xf32> to vector<16x1xf32>
    %cst_25 = arith.constant 1.280000e+02 : f32
    %49 = vector.broadcast %cst_25 : f32 to vector<16x1xf32>
    %50 = arith.divf %48, %49 : vector<16x1xf32>
    %51 = vector.broadcast %43 : vector<16x1xf32> to vector<16x128xf32>
    %52 = arith.subf %39, %51 : vector<16x128xf32>
    %cst_26 = arith.constant 9.99999974E-6 : f32
    %53 = vector.broadcast %cst_26 : f32 to vector<16x1xf32>
    %54 = arith.addf %50, %53 : vector<16x1xf32>
    %55 = math.rsqrt %54 : vector<16x1xf32>
    %56 = vector.broadcast %55 : vector<16x1xf32> to vector<16x128xf32>
    %57 = arith.mulf %52, %56 : vector<16x128xf32>
    %c0_27 = arith.constant 0 : index
    %c0_28 = arith.constant 0 : index
    %58 = vector.load %arg12[%c0_27, %c0_28] : memref<1x128xf32, #tpu.memory_space<vmem>>, vector<1x128xf32>
    %59 = vector.broadcast %58 : vector<1x128xf32> to vector<16x128xf32>
    %60 = arith.mulf %57, %59 : vector<16x128xf32>
    %c0_29 = arith.constant 0 : index
    %c0_30 = arith.constant 0 : index
    %61 = vector.load %arg13[%c0_29, %c0_30] : memref<1x128xf32, #tpu.memory_space<vmem>>, vector<1x128xf32>
    %62 = vector.broadcast %61 : vector<1x128xf32> to vector<16x128xf32>
    %63 = arith.addf %60, %62 : vector<16x128xf32>
    %c0_31 = arith.constant 0 : index
    %c0_32 = arith.constant 0 : index
    %c0_33 = arith.constant 0 : index
    %64 = vector.load %arg14[%c0_31, %c0_32, %c0_33] : memref<1x16x128xf32, #tpu.memory_space<vmem>>, vector<1x16x128xf32>
    %65 = vector.shape_cast %64 : vector<1x16x128xf32> to vector<16x128xf32>
    %66 = vector.shape_cast %63 : vector<16x128xf32> to vector<1x16x128xf32>
    tpu.vector_store %arg14[%c0_31, %c0_32, %c0_33], %66 {strides = array<i32>} : memref<1x16x128xf32, #tpu.memory_space<vmem>>, vector<1x16x128xf32>,
    return
  }
  func.func @transform_0(%arg0: i32, %arg1: i32) -> (i32, i32, i32) {
    %c0_i32 = arith.constant 0 : i32
    %c0_i32_0 = arith.constant 0 : i32
    return %arg0, %arg1, %c0_i32 : i32, i32, i32
  }
  func.func @transform_1(%arg0: i32, %arg1: i32) -> (i32, i32, i32) {
    %c0_i32 = arith.constant 0 : i32
    %c0_i32_0 = arith.constant 0 : i32
    %c0_i32_1 = arith.constant 0 : i32
    return %arg0, %c0_i32, %c0_i32_0 : i32, i32, i32
  }
  func.func @transform_2(%arg0: i32, %arg1: i32) -> (i32, i32) {
    %c0_i32 = arith.constant 0 : i32
    %c0_i32_0 = arith.constant 0 : i32
    %c0_i32_1 = arith.constant 0 : i32
    return %c0_i32, %c0_i32_0 : i32, i32
  }
  func.func @transform_3(%arg0: i32, %arg1: i32) -> (i32, i32) {
    %c0_i32 = arith.constant 0 : i32
    %c0_i32_0 = arith.constant 0 : i32
    %c0_i32_1 = arith.constant 0 : i32
    return %c0_i32, %c0_i32_0 : i32, i32
  }
  func.func @transform_4(%arg0: i32, %arg1: i32) -> (i32, i32) {
    %c0_i32 = arith.constant 0 : i32
    %c0_i32_0 = arith.constant 0 : i32
    %c0_i32_1 = arith.constant 0 : i32
    return %c0_i32, %c0_i32_0 : i32, i32
  }
  func.func @transform_5(%arg0: i32, %arg1: i32) -> (i32, i32) {
    %c0_i32 = arith.constant 0 : i32
    %c0_i32_0 = arith.constant 0 : i32
    %c0_i32_1 = arith.constant 0 : i32
    return %c0_i32, %c0_i32_0 : i32, i32
  }
  func.func @transform_6(%arg0: i32, %arg1: i32) -> (i32, i32) {
    %c0_i32 = arith.constant 0 : i32
    %c0_i32_0 = arith.constant 0 : i32
    %c0_i32_1 = arith.constant 0 : i32
    return %c0_i32, %c0_i32_0 : i32, i32
  }
  func.func @transform_7(%arg0: i32, %arg1: i32) -> (i32, i32) {
    %c0_i32 = arith.constant 0 : i32
    %c0_i32_0 = arith.constant 0 : i32
    %c0_i32_1 = arith.constant 0 : i32
    return %c0_i32, %c0_i32_0 : i32, i32
  }
  func.func @transform_8(%arg0: i32, %arg1: i32) -> (i32, i32) {
    %c0_i32 = arith.constant 0 : i32
    %c0_i32_0 = arith.constant 0 : i32
    %c0_i32_1 = arith.constant 0 : i32
    return %c0_i32, %c0_i32_0 : i32, i32
  }
  func.func @transform_9(%arg0: i32, %arg1: i32) -> (i32, i32) {
    %c0_i32 = arith.constant 0 : i32
    %c0_i32_0 = arith.constant 0 : i32
    %c0_i32_1 = arith.constant 0 : i32
    return %c0_i32, %c0_i32_0 : i32, i32
  }
  func.func @transform_10(%arg0: i32, %arg1: i32) -> (i32, i32) {
    %c0_i32 = arith.constant 0 : i32
    %c0_i32_0 = arith.constant 0 : i32
    %c0_i32_1 = arith.constant 0 : i32
    return %c0_i32, %c0_i32_0 : i32, i32
  }
  func.func @transform_11(%arg0: i32, %arg1: i32) -> (i32, i32) {
    %c0_i32 = arith.constant 0 : i32
    %c0_i32_0 = arith.constant 0 : i32
    %c0_i32_1 = arith.constant 0 : i32
    return %c0_i32, %c0_i32_0 : i32, i32
  }
  func.func @transform_12(%arg0: i32, %arg1: i32) -> (i32, i32, i32) {
    %c0_i32 = arith.constant 0 : i32
    %c0_i32_0 = arith.constant 0 : i32
    return %arg0, %arg1, %c0_i32 : i32, i32, i32
  }
}

</mosaic_0001>

<bundles_post_ra>
// kernel: tpu_custom_call.1
= control target key start
LH: loop header
LB: loop body
LE: loop exit
PB: predicated region body
PF: predicated region fallthrough
CT: control target
= control target key end

     0   :  { %s4440_s0 = inlined_call_operand.hbm [shape: f32[2,16,128], index: 0, kind: input, shape index: {}]   ;;  %s4441_s1 = inlined_call_operand.hbm [shape: f32[2,32,128], index: 1, kind: input, shape index: {}]   ;;  %s4442_s2 = inlined_call_operand.hbm [shape: bf16[128,128], index: 2, kind: input, shape index: {}]   ;;  %s4443_s3 = inlined_call_operand.hbm [shape: bf16[128,128], index: 3, kind: input, shape index: {}]   ;;  %s4444_s4 = inlined_call_operand.hbm [shape: bf16[128,128], index: 4, kind: input, shape index: {}]   ;;  %s4445_s5 = inlined_call_operand.hbm [shape: bf16[128,128], index: 5, kind: input, shape index: {}]   ;;  %s4446_s6 = inlined_call_operand.vmem [shape: f32[1,128], index: 6, kind: input, shape index: {}]   ;;  %s4447_s7 = inlined_call_operand.vmem [shape: f32[1,128], index: 7, kind: input, shape index: {}]   ;;  %s4448_s8 = inlined_call_operand.vmem [shape: f32[1,128], index: 8, kind: input, shape index: {}]   ;;  %s4449_s9 = inlined_call_operand.vmem [shape: f32[1,128], index: 9, kind: input, shape index: {}]   ;;  %s4450_s10 = inlined_call_operand.vmem [shape: f32[1,128], index: 10, kind: input, shape index: {}]   ;;  %s4451_s11 = inlined_call_operand.vmem [shape: f32[1,128], index: 11, kind: input, shape index: {}]   ;;  %s4452_s12 = inlined_call_operand.hbm [shape: f32[2,16,128], index: 12, kind: output, shape index: {}]  }
   0x1   :  { %4459 = sst [smem:[#allocation25_spill]] %s4440_s0 }
   0x2   :  { %4460 = sst [smem:[#allocation26_spill]] %s4442_s2 }
   0x3   :  { %4461 = sst [smem:[#allocation27_spill]] %s4443_s3 }
   0x4   :  { %4462 = sst [smem:[#allocation28_spill]] %s4444_s4 }
   0x5   :  { %4463 = sst [smem:[#allocation29_spill]] %s4448_s8 }
   0x6   :  { %4464 = sst [smem:[#allocation30_spill]] %s4449_s9 }
   0x7   :  { %4465 = sst [smem:[#allocation31_spill]] %s4450_s10 }
   0x8   :  { %4466 = sst [smem:[#allocation32_spill]] %s4451_s11 }
   0x9   :  { %4467 = sst [smem:[#allocation33_spill]] %s4452_s12 }
   0xa   :  { %17 = vsyncpa [#allocation5], 0 }
   0xb   :  { %19 = vsyncpa [#allocation5 + $0x1], 0 }
   0xc   :  { %20 = vsyncpa [#allocation8], 0 }
   0xd   :  { %22 = vsyncpa [#allocation8 + $0x1], 0 }
   0xe   :  { %23 = vsyncpa [#allocation11], 0 }
   0xf   :  { %24 = vsyncpa [#allocation14], 0 }
  0x10   :  { %25 = vsyncpa [#allocation6], 0 }
  0x11   :  { %27 = vsyncpa [#allocation6 + $0x1], 0  ;;  %s3749_s21 = smov 0   ;;  %s3751_s22 = smov 0  }
  0x12   :  { %s3753_s23 = smov 0   ;;  %s3755_s24 = smov 0  }
  0x13   :  { %s3757_s25 = smov 0   ;;  %s3759_s26 = smov 0  }
  0x14 LB: > { %4468 = sst [smem:[#allocation22_spill]] %s3647_s21  ;;  %s3780_s27 = sadd.s32 4294967295, %s3667_s26   ;;  %s3667_s26 = sphi %s3759_s26, %s33_s26   ;;  %s3663_s25 = sphi %s3757_s25, %s4505_s25   ;;  %s3659_s24 = sphi %s3755_s24, %s4504_s24   ;;  %s3655_s23 = sphi %s3753_s23, %s4503_s23   ;;  %s3651_s22 = sphi %s3751_s22, %s4502_s22   ;;  %s3647_s21 = sphi %s3749_s21, %s4501_s21  }
  0x15   : > { %4469 = sst [smem:[#allocation23_spill]] %s3659_s24  ;;  %s2850_s28 = sadd.s32 4294967294, %s3667_s26  }
  0x16   : > { %p67_p0 = scmp.ne.s32.totalorder %s3651_s22, %s3647_s21  ;;  %p4456_p1 = scmp.eq.s32.totalorder %s3780_s27, 0 }
  0x17   : > { %p335_p3 = scmp.eq.s32.totalorder %s2850_s28, 1  ;;  %p2851_p5 = scmp.ge.s32.totalorder %s3667_s26, 1 }
  0x18   : > { %p3789_p4 = por %p4456_p1, %p67_p0  ;;  %p342_p7 = scmp.lt.s32.totalorder %s3667_s26, 3 }
  0x19   : > { %p3794_p6 = por %p335_p3, %p67_p0  ;;  %s3669_s14 = smov [#allocation9]  }
  0x1a   : > { %s4470_s29 = scalar_select %p3789_p4, 1, 0 }
  0x1b   : > { %s4471_s30 = scalar_select %p3794_p6, 1, 0 }
  0x1c   : > { %p3799_p8 = pnand %p2851_p5, %p342_p7  ;;  %s354_s15 = sshll.u32 %s3669_s14, 4  ;;  %s3803_s15 = int_to_ptr.vmem [resolvable:$true] %s354_s15 }
  0x1d   : > { %4472 = sst [smem:[#allocation24_spill]] %s4471_s30  ;;  %s3670_s17 = smov [#allocation10]  }
  0x1e   : > { %s4473_s13 = scalar_select %p3799_p8, 1, 0 }
  0x1f   : > { %p3201_p9 = pneg %p3799_p8  ;;  %s367_s18 = sshll.u32 %s3670_s17, 4  ;;  %s3814_s18 = int_to_ptr.vmem [resolvable:$true] %s367_s18 }
  0x20   : > { %s3671_s19 = smov [#allocation12]   ;;  %s4475_s2 = sld [smem:[#allocation26_spill]] }
  0x21   : > { %p3810_p11 = pnand %p3201_p9, %p4456_p1  ;;  %s3816_s20 = sshll.u32 %s3671_s19, 4  ;;  %s381_s20 = int_to_ptr.vmem [resolvable:$true] %s3816_s20 }
  0x23   : > { %p3826_p13 = pneg %p3810_p11 }
  0x26   : > { %s3397_s30 = scalar_lea.hbm %s4475_s2, 1024 }
  0x27   : > { %p3398_p12 = scmp.ne.s32.totalorder %s4475_s2, %s3397_s30  ;;  %p3404_p5 = scmp.lt.u32.totalorder %s3397_s30, %s4475_s2 }
  0x29   : > { %p3400_p0 = pnand %p3826_p13, %p3398_p12 }
  0x2b   : > { %p3401_p3 = pneg %p3400_p0 }
  0x2d   : > { %p3406_p7 = pnand %p3404_p5, %p3401_p3 }
  0x2f   : > { %3409 = shalt.err (!%p3406_p7)
}
  0x30   : > { %s3410_s12 = scalar_lea.vmem %s3803_s15, 1024  ;;  %p3418_p2 = scmp.lt.s32.totalorder %s3803_s15, %s3803_s15 }
  0x31   : > { %p3411_p9 = scmp.ne.s32.totalorder %s3803_s15, %s3410_s12  ;;  %p3419_p6 = scmp.lt.s32.totalorder %s3410_s12, %s3410_s12 }
  0x33   : > { %p3413_p10 = pnand %p3411_p9, %p3826_p13  ;;  %p3420_p12 = por %p3419_p6, %p3418_p2 }
  0x35   : > { %p3414_p1 = pneg %p3413_p10 }
  0x37   : > { %p3421_p0 = pnand %p3420_p12, %p3414_p1 }
  0x39   : > { %3424 = shalt.err (!%p3421_p0)
}
  0x3a   : > { %s3672_s21 = smov 64   ;;  %s3673_s30 = smov 4  }
  0x3b   : > { %3204 = dma.hbm_to_vmem [thread:$0]  (!%p3810_p11), %s4475_s2, 1024, %s3803_s15, [#allocation8], %s3672_s21, %s3672_s21, %s3673_s30  }
  0x3c   : > { %s4477_s3 = sld [smem:[#allocation27_spill]] }
  0x42   : > { %s3425_s12 = scalar_lea.hbm %s4477_s3, 1024 }
  0x43   : > { %p3426_p1 = scmp.ne.s32.totalorder %s4477_s3, %s3425_s12  ;;  %p3432_p10 = scmp.lt.u32.totalorder %s3425_s12, %s4477_s3 }
  0x45   : > { %p3428_p2 = pnand %p3426_p1, %p3826_p13 }
  0x47   : > { %p3429_p6 = pneg %p3428_p2 }
  0x49   : > { %p3434_p3 = pnand %p3432_p10, %p3429_p6 }
  0x4b   : > { %3437 = shalt.err (!%p3434_p3)
}
  0x4c   : > { %s3438_s15 = scalar_lea.vmem %s3814_s18, 1024  ;;  %p3446_p12 = scmp.lt.s32.totalorder %s3814_s18, %s3814_s18 }
  0x4d   : > { %p3439_p5 = scmp.ne.s32.totalorder %s3814_s18, %s3438_s15  ;;  %p3447_p0 = scmp.lt.s32.totalorder %s3438_s15, %s3438_s15 }
  0x4f   : > { %p3441_p7 = pnand %p3439_p5, %p3826_p13  ;;  %p3448_p1 = por %p3447_p0, %p3446_p12 }
  0x51   : > { %p3442_p9 = pneg %p3441_p7 }
  0x53   : > { %p3449_p2 = pnand %p3448_p1, %p3442_p9 }
  0x55   : > { %3452 = shalt.err (!%p3449_p2)
}
  0x56   : > { %3207 = dma.hbm_to_vmem [thread:$0]  (!%p3810_p11), %s4477_s3, 1024, %s3814_s18, [#allocation11], %s3672_s21, %s3672_s21, %s3673_s30  }
  0x57   : > { %s4478_s4 = sld [smem:[#allocation28_spill]] }
  0x5d   : > { %s3453_s28 = scalar_lea.hbm %s4478_s4, 1024 }
  0x5e   : > { %p3454_p6 = scmp.ne.s32.totalorder %s4478_s4, %s3453_s28  ;;  %p3460_p5 = scmp.lt.u32.totalorder %s3453_s28, %s4478_s4 }
  0x60   : > { %p3456_p10 = pnand %p3454_p6, %p3826_p13 }
  0x62   : > { %p3457_p3 = pneg %p3456_p10 }
  0x64   : > { %p3462_p7 = pnand %p3460_p5, %p3457_p3 }
  0x66   : > { %3465 = shalt.err (!%p3462_p7)
}
  0x67   : > { %s3466_s15 = scalar_lea.vmem %s381_s20, 1024  ;;  %p3474_p1 = scmp.lt.s32.totalorder %s381_s20, %s381_s20 }
  0x68   : > { %p3467_p9 = scmp.ne.s32.totalorder %s381_s20, %s3466_s15  ;;  %p3475_p2 = scmp.lt.s32.totalorder %s3466_s15, %s3466_s15 }
  0x6a   : > { %p3469_p12 = pnand %p3467_p9, %p3826_p13  ;;  %p3476_p4 = por %p3475_p2, %p3474_p1 }
  0x6c   : > { %p3470_p0 = pneg %p3469_p12 }
  0x6e   : > { %p3477_p8 = pnand %p3476_p4, %p3470_p0 }
  0x70   : > { %3480 = shalt.err (!%p3477_p8)
}
  0x71   : > { %3210 = dma.hbm_to_vmem [thread:$0]  (!%p3810_p11), %s4478_s4, 1024, %s381_s20, [#allocation11], %s3672_s21, %s3672_s21, %s3673_s30  }
  0x72   : > { %s3674_s9 = smov [#allocation13]   ;;  %s3481_s14 = scalar_lea.hbm %s4445_s5, 1024 }
  0x73   : > { %s393_s10 = sshll.u32 %s3674_s9, 4  ;;  %p3482_p4 = scmp.ne.s32.totalorder %s4445_s5, %s3481_s14  ;;  %s394_s10 = int_to_ptr.vmem [resolvable:$true] %s393_s10 }
  0x74   : > { %p3488_p10 = scmp.lt.u32.totalorder %s3481_s14, %s4445_s5 }
  0x75   : > { %p3484_p8 = pnand %p3482_p4, %p3826_p13 }
  0x77   : > { %p3485_p6 = pneg %p3484_p8 }
  0x79   : > { %p3490_p3 = pnand %p3488_p10, %p3485_p6 }
  0x7b   : > { %3493 = shalt.err (!%p3490_p3)
}
  0x7c   : > { %s3494_s20 = scalar_lea.vmem %s394_s10, 1024  ;;  %p3502_p12 = scmp.lt.s32.totalorder %s394_s10, %s394_s10 }
  0x7d   : > { %p3495_p5 = scmp.ne.s32.totalorder %s394_s10, %s3494_s20  ;;  %p3503_p0 = scmp.lt.s32.totalorder %s3494_s20, %s3494_s20 }
  0x7f   : > { %p3497_p7 = pnand %p3495_p5, %p3826_p13  ;;  %p3504_p1 = por %p3503_p0, %p3502_p12 }
  0x81   : > { %p3498_p9 = pneg %p3497_p7 }
  0x83   : > { %p3505_p2 = pnand %p3504_p1, %p3498_p9 }
  0x85   : > { %3508 = shalt.err (!%p3505_p2)
}
  0x86   : > { %3213 = dma.hbm_to_vmem [thread:$0]  (!%p3810_p11), %s4445_s5, 1024, %s394_s10, [#allocation14], %s3672_s21, %s3672_s21, %s3673_s30  }
  0x87   : > { %s45_s11 = sadd.s32 1, %s3663_s25  ;;  %s54_s16 = sadd.s32 1, %s3655_s23 }
  0x88   : > { %p47_p13 = scmp.ge.s32.totalorder %s45_s11, 2  ;;  %p61_p4 = scmp.ne.s32.totalorder %s3655_s23, %s3651_s22 }
  0x89   : > { %p62_p8 = scmp.eq.s32.totalorder %s3667_s26, 0  ;;  %p3229_p6 = scmp.lt.s32.totalorder %s3667_s26, 2 }
  0x8a   : > { %s4507_s11 = smov (%p47_p13, %s45_s11), 0  ;;  %p4479_p3 = scmp.eq.s32.totalorder %s3780_s27, 1 }
  0x8b   : > { %p63_p10 = por %p62_p8, %p61_p4  ;;  %s49_s24 = ssub.s32 %s3663_s25, %s4507_s11 }
  0x8c   : > { %p3929_p5 = por %p4479_p3, %p61_p4  ;;  %s3936_s28 = sand.u32 1, %s3655_s23  }
  0x8d   : > { %p52_p11 = scmp.eq.s32.totalorder %s49_s24, 0  ;;  %s2857_s21 = sshll.u32 %s3936_s28, 4 }
  0x8e   : > { %s2930_s30 = sshll.u32 %s3663_s25, 8  ;;  %s4481_s0 = sld [smem:[#allocation25_spill]] }
  0x8f   : > { %s3941_s10 = scalar_select %p52_p11, %s3655_s23, %s54_s16  }
  0x90   : > { %s429_s12 = scalar_lea.vmem [#allocation4], %s2857_s21  ;;  %p3950_p7 = pnand %p3229_p6, %p63_p10 }
  0x91   : > { %s438_s15 = sshll.u32 %s429_s12, 4  ;;  %s426_s18 = scalar_lea.sflag [#allocation5], %s3936_s28  ;;  %s3954_s15 = int_to_ptr.vmem [resolvable:$true] %s438_s15 }
  0x92   : > { %p3511_p12 = pneg %p3950_p7 }
  0x94   : > { %s3946_s19 = scalar_lea.hbm %s4481_s0, %s2930_s30  ;;  %s3514_s21 = scalar_lea.hbm %s4481_s0, 512 }
  0x95   : > { %s3509_s8 = scalar_lea.hbm %s3946_s19, 256  ;;  %p3515_p2 = scmp.lt.u32.totalorder %s3946_s19, %s4481_s0 }
  0x96   : > { %p3510_p9 = scmp.ne.s32.totalorder %s3946_s19, %s3509_s8  ;;  %p3516_p13 = scmp.lt.u32.totalorder %s3514_s21, %s3509_s8 }
  0x97   : > { %p3518_p8 = scmp.lt.u32.totalorder %s3509_s8, %s3946_s19 }
  0x98   : > { %p3512_p0 = pnand %p3511_p12, %p3510_p9  ;;  %p3517_p4 = por %p3516_p13, %p3515_p2 }
  0x9a   : > { %p3513_p1 = pneg %p3512_p0  ;;  %p3519_p6 = por %p3518_p8, %p3517_p4 }
  0x9c   : > { %p3520_p10 = pnand %p3519_p6, %p3513_p1 }
  0x9e   : > { %3523 = shalt.err (!%p3520_p10)
}
  0x9f   : > { %s3524_s17 = scalar_lea.vmem %s3954_s15, 256  ;;  %s3675_s12 = smov [#allocation4]  }
  0xa0   : > { %p3525_p3 = scmp.ne.s32.totalorder %s3954_s15, %s3524_s17  ;;  %s3529_s16 = sshll.u32 %s3675_s12, 4  ;;  %s3530_s16 = int_to_ptr.vmem [resolvable:$false] %s3529_s16 }
  0xa1   : > { %s3531_s24 = scalar_lea.vmem %s3530_s16, 512  ;;  %p3532_p0 = scmp.lt.s32.totalorder %s3954_s15, %s3530_s16 }
  0xa2   : > { %p3527_p11 = pnand %p3525_p3, %p3511_p12  ;;  %p3533_p2 = scmp.lt.s32.totalorder %s3531_s24, %s3524_s17 }
  0xa4   : > { %p3528_p9 = pneg %p3527_p11  ;;  %p3534_p13 = por %p3533_p2, %p3532_p0 }
  0xa6   : > { %p3535_p4 = pnand %p3534_p13, %p3528_p9 }
  0xa8   : > { %3538 = shalt.err (!%p3535_p4)
}
  0xa9   : > { %s3676_s8 = smov 128   ;;  %s3677_s21 = smov 8  }
  0xaa   : > { %3217 = dma.hbm_to_vmem [thread:$0]  (!%p3950_p7), %s3946_s19, 256, %s3954_s15, %s426_s18, %s3676_s8, %s3676_s8, %s3677_s21  }
  0xab   : > { %s448_s30 = sand.u32 1, %s3667_s26   ;;  %s2860_s14 = sshll.u32 %s3936_s28, 5 }
  0xac   : > { %s2931_s17 = sshll.u32 %s3663_s25, 9  ;;  %s452_s12 = scalar_lea.vmem [#allocation7], %s2860_s14 }
  0xad   : > { %s459_s16 = sshll.u32 %s452_s12, 4  ;;  %s3993_s2 = scalar_lea.hbm %s4441_s1, %s2931_s17  ;;  %s3995_s16 = int_to_ptr.vmem [resolvable:$true] %s459_s16 }
  0xae   : > { %s3997_s3 = scalar_lea.sflag [#allocation8], %s448_s30  ;;  %s3539_s4 = scalar_lea.hbm %s3993_s2, 512 }
  0xaf   : > { %p3540_p1 = scmp.ne.s32.totalorder %s3993_s2, %s3539_s4  ;;  %s3544_s0 = scalar_lea.hbm %s4441_s1, 1024 }
  0xb0   : > { %p3545_p10 = scmp.lt.u32.totalorder %s3993_s2, %s4441_s1  ;;  %p3546_p3 = scmp.lt.u32.totalorder %s3544_s0, %s3539_s4 }
  0xb1   : > { %p3542_p8 = pnand %p3540_p1, %p3511_p12  ;;  %p3548_p9 = scmp.lt.u32.totalorder %s3539_s4, %s3993_s2 }
  0xb2   : > { %p3547_p11 = por %p3546_p3, %p3545_p10 }
  0xb3   : > { %p3543_p6 = pneg %p3542_p8 }
  0xb4   : > { %p3549_p0 = por %p3548_p9, %p3547_p11 }
  0xb6   : > { %p3550_p2 = pnand %p3549_p0, %p3543_p6 }
  0xb8   : > { %3553 = shalt.err (!%p3550_p2)
}
  0xb9   : > { %s3554_s30 = scalar_lea.vmem %s3995_s16, 512  ;;  %s3678_s14 = smov [#allocation7]  }
  0xba   : > { %p3555_p13 = scmp.ne.s32.totalorder %s3995_s16, %s3554_s30  ;;  %s3559_s17 = sshll.u32 %s3678_s14, 4  ;;  %s3560_s17 = int_to_ptr.vmem [resolvable:$false] %s3559_s17 }
  0xbb   : > { %s3561_s12 = scalar_lea.vmem %s3560_s17, 1024  ;;  %p3562_p8 = scmp.lt.s32.totalorder %s3995_s16, %s3560_s17 }
  0xbc   : > { %p3557_p4 = pnand %p3555_p13, %p3511_p12  ;;  %p3563_p10 = scmp.lt.s32.totalorder %s3561_s12, %s3554_s30 }
  0xbe   : > { %p3558_p1 = pneg %p3557_p4  ;;  %p3564_p3 = por %p3563_p10, %p3562_p8 }
  0xc0   : > { %p3565_p11 = pnand %p3564_p3, %p3558_p1 }
  0xc2   : > { %3568 = shalt.err (!%p3565_p11)
}
  0xc3   : > { %3220 = dma.hbm_to_vmem [thread:$0]  (!%p3950_p7), %s3993_s2, 512, %s3995_s16, %s3997_s3, %s3676_s8, %s3676_s8, %s3677_s21  }
  0xc4   : > { %p4483_p12 = scmp.ne.s32.totalorder %s4473_s13, 0 }
  0xc5   : > { %s4029_s4 = sand.u32 (!%p4483_p12), 1, %s3651_s22   ;;  %p4484_p6 = scmp.ne.s32.totalorder (!%p4483_p12), %s4470_s29, 0 }
  0xc6   : > { %471 = sbr.rel (%p4483_p12) target bundleno = 2406 (0x966), region = 68  ;;  %s2864_s24 = sshll.u32 (!%p4483_p12), %s4029_s4, 4 }
  0xc7   : > { %s474_s28 = scalar_lea.sflag (!%p4483_p12), [#allocation5], %s4029_s4  ;;  %s4035_s20 = scalar_lea.vmem (!%p4483_p12), [#allocation4], %s2864_s24 }
  0xcd   : > { %3622 = dma.done.wait (%p4484_p6), %s474_s28, 256  }
  0xce   : > { %3624 = vsyncadd (%p4484_p6), %s474_s28, 4294967040  ;;  %s482_s2 = sand.u32 1, %s3780_s27   ;;  %s2865_s3 = sshll.u32 %s4029_s4, 5 }
  0xcf   : > { %s483_s13 = scalar_lea.sflag [#allocation8], %s482_s2  ;;  %s4043_s8 = scalar_lea.vmem [#allocation7], %s2865_s3 }
  0xd0   : > { %3626 = dma.done.wait (%p4484_p6), %s483_s13, 512  }
  0xd1   : > { %3628 = vsyncadd (%p4484_p6), %s483_s13, 4294966784  ;;  %p4485_p7 = scmp.eq.s32.totalorder %s3780_s27, 0 }
  0xd3   : > { %3630 = dma.done.wait (%p4485_p7), [#allocation8], 1024   ;;  %p4486_p9 = pmov %p4485_p7 }
  0xd4   : > { %p4487_p0 = pmov %p4485_p7 }
  0xd5   : > { %3632 = vsyncadd (%p4486_p9), [#allocation8], 4294966272 }
  0xd6   : > { %3634 = dma.done.wait (%p4487_p0), [#allocation11], 2048   ;;  %p4488_p2 = pmov %p4487_p0 }
  0xd7   : > { %p4489_p13 = pmov %p4487_p0 }
  0xd8   : > { %3636 = vsyncadd (%p4488_p2), [#allocation11], 4294965248 }
  0xd9   : > { %3638 = dma.done.wait (%p4489_p13), [#allocation14], 1024   ;;  %p4490_p4 = pmov %p4487_p0 }
  0xda   : > { %v3295_v0 = vld [vmem:[#allocation10] sm:$0xff]   ;;  %v3296_v1 = vld [vmem:[#allocation10 + $0x8] sm:$0xff]   ;;  %v3297_v2 = vld [vmem:[#allocation10 + $0x10] sm:$0xff]   ;;  %v3679_v15 = vmov 0.0   ;;  %vm3680_vm0 = vmmov 0   ;;  %vm841_vm1 = vcmask 261120  }
  0xdb   : > { %3640 = vsyncadd (%p4490_p4), [#allocation14], 4294966272  ;;  %3003 = vmatprep.subr.bf16.mxu0 %v3295_v0  ;;  %v3298_v3 = vld [vmem:[#allocation10 + $0x18] sm:$0xff]   ;;  %v555_v4 = vld [vmem:[%s4043_s8] sm:$0xff]  ;;  %vm1325_vm2 = vcmask 130048   ;;  %s4491_s15 = sld [smem:[#allocation29_spill]] }
  0xdc   : > { %3004 = vmatpush3.bf16.msra.mxu0 %v3295_v0  ;;  %v556_v5 = vld [vmem:[%s4043_s8 + $0x8] sm:$0xff]  ;;  %v3299_v7 = vld [vmem:[#allocation10 + $0x20] sm:$0xff]   ;;  %v3301_v9 = vld [vmem:[#allocation10 + $0x30] sm:$0xff]   ;;  %s4492_s14 = sld [smem:[#allocation30_spill]]  ;;  %s4493_s17 = sld [smem:[#allocation23_spill]] }
  0xdd   : > { %3005 = vmatprep.subr.bf16.mxu0 %v3296_v1  ;;  %v559_v6 = vpack.c.bf16 %v556_v5, %v555_v4  ;;  %v3300_v8 = vld [vmem:[#allocation10 + $0x28] sm:$0xff]   ;;  %v3302_v10 = vld [vmem:[#allocation10 + $0x38] sm:$0xff]   ;;  %v557_v11 = vld [vmem:[%s4043_s8 + $0x10] sm:$0xff]  ;;  %s4495_s13 = sld [smem:[#allocation32_spill]]  ;;  %s547_s27 = scalar_lea.vmem [#allocation15], %s2864_s24 }
  0xde   : > { %v558_v12 = vld [vmem:[%s4043_s8 + $0x18] sm:$0xff]  ;;  %v3303_v14 = vld [vmem:[#allocation9] sm:$0xff]   ;;  %v3304_v16 = vld [vmem:[#allocation9 + $0x8] sm:$0xff]   ;;  %s2701_s29 = sshll.u32 %s547_s27, 4  ;;  %s4496_s19 = sld [smem:[#allocation33_spill]]  ;;  %s4391_s29 = int_to_ptr.vmem [resolvable:$true] %s2701_s29 }
  0xdf   : > { %3019 = vmatprep.mubr.bf16.mxu0 %v559_v6  ;;  %3039 = vmatprep.mubr.bf16.mxu1 %v559_v6  ;;  %v4065_v13 = vpack.c.bf16 %v558_v12, %v557_v11  ;;  %v3305_v17 = vld [vmem:[#allocation9 + $0x10] sm:$0xff]   ;;  %v3306_v18 = vld [vmem:[#allocation9 + $0x18] sm:$0xff]   ;;  %v3307_v19 = vld [vmem:[#allocation9 + $0x20] sm:$0xff]   ;;  %s3569_s18 = scalar_lea.vmem %s4391_s29, 256  ;;  %s3681_s24 = smov [#allocation15]  }
  0xe0   : > { %3006 = vmatpush3.bf16.msra.mxu0 %v3296_v1  ;;  %v3308_v20 = vld [vmem:[#allocation9 + $0x28] sm:$0xff]   ;;  %v3309_v21 = vld [vmem:[#allocation9 + $0x30] sm:$0xff]   ;;  %v3310_v22 = vld [vmem:[#allocation9 + $0x38] sm:$0xff]   ;;  %p3570_p1 = scmp.ne.s32.totalorder %s4391_s29, %s3569_s18  ;;  %s3573_s30 = sshll.u32 %s3681_s24, 4  ;;  %s3574_s30 = int_to_ptr.vmem [resolvable:$false] %s3573_s30 }
  0xe1   : > { %3007 = vmatprep.subr.bf16.mxu0 %v3297_v2  ;;  %v898_v23 = vld [vmem:[%s4035_s20] sm:$0xff]  ;;  %v899_v24 = vld [vmem:[%s4035_s20 + $0x8] sm:$0xff]  ;;  %p3576_p3 = scmp.lt.s32.totalorder %s4391_s29, %s3574_s30 }
  0xe2   : > { %v900_v25 = vpack.c.bf16 %v899_v24, %v898_v23  ;;  %v2871_v26 = vld [vmem:[%s4447_s7] ss:$0 sm:$0xff]  ;;  %v3312_v43 = vld [vmem:[#allocation12 + $0x8] sm:$0xff]   ;;  %v3313_v44 = vld [vmem:[#allocation12 + $0x10] sm:$0xff]   ;;  %s2932_s8 = sshll.u32 %s4493_s17, 8  ;;  %p3571_p8 = pnand %p3570_p1, %p3929_p5 }
  0xe3   : > { %v2889_v35 = vld [vmem:[%s4446_s6] ss:$0 sm:$0xff]  ;;  %v3314_v45 = vld [vmem:[#allocation12 + $0x18] sm:$0xff]   ;;  %v3316_v47 = vld [vmem:[#allocation12 + $0x28] sm:$0xff]  }
  0xe4   : > { %3008 = vmatpush3.bf16.msra.mxu0 %v3297_v2  ;;  %v3311_v42 = vld [vmem:[#allocation12] sm:$0xff]   ;;  %v3317_v48 = vld [vmem:[#allocation12 + $0x30] sm:$0xff]   ;;  %v3318_v49 = vld [vmem:[#allocation12 + $0x38] sm:$0xff]   ;;  %s4389_s0 = scalar_lea.hbm %s4496_s19, %s2932_s8  ;;  %p3572_p10 = pneg %p3571_p8 }
  0xe5   : > { %3009 = vmatprep.subr.bf16.mxu0 %v3298_v3  ;;  %3023 = vmatprep.subr.bf16.mxu1 %v3311_v42  ;;  %v3315_v46 = vld [vmem:[#allocation12 + $0x20] sm:$0xff]  }
  0xe6   : > { %3024 = vmatpush3.bf16.msra.mxu1 %v3311_v42 }
  0xe7   : > { %3025 = vmatprep.subr.bf16.mxu1 %v3312_v43 }
  0xe8   : > { %3010 = vmatpush3.bf16.msra.mxu0 %v3298_v3 }
  0xe9   : > { %3011 = vmatprep.subr.bf16.mxu0 %v3299_v7 }
  0xea   : > { %3026 = vmatpush3.bf16.msra.mxu1 %v3312_v43 }
  0xeb   : > { %3027 = vmatprep.subr.bf16.mxu1 %v3313_v44 }
  0xec   : > { %3012 = vmatpush3.bf16.msra.mxu0 %v3299_v7 }
  0xed   : > { %3013 = vmatprep.subr.bf16.mxu0 %v3300_v8 }
  0xee   : > { %3028 = vmatpush3.bf16.msra.mxu1 %v3313_v44 }
  0xef   : > { %3029 = vmatprep.subr.bf16.mxu1 %v3314_v45 }
  0xf0   : > { %3014 = vmatpush3.bf16.msra.mxu0 %v3300_v8 }
  0xf1   : > { %3015 = vmatprep.subr.bf16.mxu0 %v3301_v9 }
  0xf2   : > { %3030 = vmatpush3.bf16.msra.mxu1 %v3314_v45 }
  0xf3   : > { %3031 = vmatprep.subr.bf16.mxu1 %v3315_v46 }
  0xf4   : > { %3016 = vmatpush3.bf16.msra.mxu0 %v3301_v9 }
  0xf5   : > { %3017 = vmatprep.subr.bf16.mxu0 %v3302_v10 }
  0xf6   : > { %3032 = vmatpush3.bf16.msra.mxu1 %v3315_v46 }
  0xf7   : > { %3033 = vmatprep.subr.bf16.mxu1 %v3316_v47 }
  0xf8   : > { %3018 = vmatpush3.bf16.msra.mxu0 %v3302_v10 }
  0xf9   : > { %3043 = vmatprep.subr.bf16.mxu0 %v3679_v15 }
  0xfa   : > { %3034 = vmatpush3.bf16.msra.mxu1 %v3316_v47 }
  0xfb   : > { %3020 = vmatmul.mubr.bf16.vlgmr.msra.gmra.mrb[0].mxu0 %v4065_v13  ;;  %3035 = vmatprep.subr.bf16.mxu1 %v3317_v48 }
  0xfc   : > { %3044 = vmatpush3.bf16.msra.mxu0 %v3303_v14  ;;  %3059 = vmatprep.mubr.msk.bf16.mxu0 %vm3680_vm0, %v3679_v15 }
  0xfd   : > { %3045 = vmatprep.subr.bf16.mxu0 %v3679_v15 }
  0xfe   : > { %3036 = vmatpush3.bf16.msra.mxu1 %v3317_v48 }
  0xff   : > { %3037 = vmatprep.subr.bf16.mxu1 %v3318_v49 }
 0x100   : > { %3046 = vmatpush3.bf16.msra.mxu0 %v3304_v16 }
 0x101   : > { %3047 = vmatprep.subr.bf16.mxu0 %v3679_v15 }
 0x102   : > { %3038 = vmatpush3.bf16.msra.mxu1 %v3318_v49 }
 0x103   : > { %3063 = vmatprep.subr.bf16.mxu1 %v3679_v15 }
 0x104   : > { %3048 = vmatpush3.bf16.msra.mxu0 %v3305_v17 }
 0x105   : > { %3049 = vmatprep.subr.bf16.mxu0 %v3679_v15  ;;  %3040 = vmatmul.mubr.bf16.vlgmr.msra.gmra.mrb[0].mxu1 %v4065_v13 }
 0x106   : > { %3065 = vmatprep.mubr.msk.bf16.mxu1 %vm3680_vm0, %v3679_v15 }
 0x108   : > { %3050 = vmatpush3.bf16.msra.mxu0 %v3306_v18 }
 0x109   : > { %3051 = vmatprep.subr.bf16.mxu0 %v3679_v15 }
 0x10c   : > { %3052 = vmatpush3.bf16.msra.mxu0 %v3307_v19 }
 0x10d   : > { %3053 = vmatprep.subr.bf16.mxu0 %v3679_v15 }
 0x110   : > { %3054 = vmatpush3.bf16.msra.mxu0 %v3308_v20 }
 0x111   : > { %3055 = vmatprep.subr.bf16.mxu0 %v3679_v15 }
 0x114   : > { %3056 = vmatpush3.bf16.msra.mxu0 %v3309_v21 }
 0x115   : > { %3057 = vmatprep.subr.bf16.mxu0 %v3679_v15 }
 0x118   : > { %3058 = vmatpush3.bf16.msra.mxu0 %v3310_v22 }
 0x119   : > { %3111 = vmatprep.subr.bf16.mxu0 %v3679_v15 }
 0x11b   : > { %3060 = vmatmul.mubr.bf16.vlgmr.msra.gmra.mrb[4].mxu0 %v900_v25 }
 0x11c   : > { %3113 = vmatprep.mubr.msk.bf16.mxu0 %vm3680_vm0, %v3679_v15 }
 0x1ce   : > { %v3021_v27 = vpop.f32.mrb[0].mxu0 }
 0x1cf   : > { %v666_v28 = vpop.f32.mrb[1].mxu0  ;;  %v675_v33 = vadd.f32 %v3021_v27, %v2871_v26 }
 0x1d0   : > { %v3022_v29 = vpop.f32.mrb[2].mxu0  ;;  %v667_v30 = vadd.f32 %v2871_v26, %v666_v28 }
 0x1d1   : > { %v669_v31 = vpop.f32.mrb[3].mxu0  ;;  %v678_v34 = vadd.f32 %v3022_v29, %v2871_v26 }
 0x1d2   : > { %801 = vxpose.xlu1.b32.start [1/4] (short) %v667_v30, 128  ;;  %v670_v32 = vadd.f32 %v2871_v26, %v669_v31 }
 0x1d6   : > { %802 = vxpose.xlu1.b32.cont [2/4] (short) %v670_v32, 128 }
 0x1d8   : > { %v4118_v47 = vpop.f32.mrb[0].mxu1 }
 0x1d9   : > { %v4120_v48 = vpop.f32.mrb[1].mxu1 }
 0x1da   : > { %803 = vxpose.xlu1.b32.cont [3/4] (short) %v675_v33, 128 }
 0x1de   : > { %804 = vxpose.xlu1.b32.end [4/4] (short) %v678_v34, 128 }
 0x1ee   : > { %v1006_v36 = vpop.f32.mrb[4].mxu0 }
 0x1ef   : > { %v3061_v37 = vpop.f32.mrb[5].mxu0  ;;  %v1007_v38 = vadd.f32 %v2889_v35, %v1006_v36 }
 0x1f0   : > { %v1009_v39 = vpop.f32.mrb[6].mxu0 }
 0x1f1   : > { %1013 = vxpose.xlu0.b32.start [1/2] (short) %v1007_v38, 128  ;;  %v3062_v40 = vpop.f32.mrb[7].mxu0  ;;  %v1010_v41 = vadd.f32 %v2889_v35, %v1009_v39 }
 0x1f5   : > { %1014 = vxpose.xlu0.b32.end [2/2] (short) %v1010_v41, 128 }
 0x252   : > { %v817_v50 = vpop.trf.xlu1 }
 0x256   : > { %v818_v51 = vpop.trf.xlu1 }
 0x257   : > { %v833_v52 = vpack.c.bf16 %v818_v51, %v817_v50  ;;  %v4123_v50 = vpop.f32.mrb[2].mxu1 }
 0x259   : > { %842 = vst.msk [vmem:[#allocation2] sm:$0xff] %vm841_vm1, %v833_v52  ;;  %v4127_v52 = vpop.f32.mrb[3].mxu1 }
 0x25a   : > { %v819_v53 = vpop.trf.xlu1 }
 0x25e   : > { %v820_v54 = vpop.trf.xlu1 }
 0x25f   : > { %v834_v55 = vpack.c.bf16 %v820_v54, %v819_v53 }
 0x260   : > { %v1309_v56 = vld [vmem:[#allocation2] sm:$0xff] }
 0x261   : > { %843 = vst.msk [vmem:[#allocation2 + $0x8] sm:$0xff] %vm841_vm1, %v834_v55  ;;  %3064 = vmatpush3.bf16.msra.mxu1 %v1309_v56 }
 0x262   : > { %v821_v57 = vpop.trf.xlu1  ;;  %3069 = vmatprep.subr.bf16.mxu1 %v3679_v15 }
 0x266   : > { %v822_v58 = vpop.trf.xlu1 }
 0x267   : > { %v835_v59 = vpack.c.bf16 %v822_v58, %v821_v57 }
 0x268   : > { %v1310_v31 = vld [vmem:[#allocation2 + $0x8] sm:$0xff] }
 0x269   : > { %844 = vst.msk [vmem:[#allocation2 + $0x10] sm:$0xff] %vm841_vm1, %v835_v59 }
 0x26a   : > { %v823_v60 = vpop.trf.xlu1 }
 0x26e   : > { %v824_v61 = vpop.trf.xlu1 }
 0x26f   : > { %v836_v62 = vpack.c.bf16 %v824_v61, %v823_v60 }
 0x270   : > { %v1311_v35 = vld [vmem:[#allocation2 + $0x10] sm:$0xff] }
 0x271   : > { %v1029_v63 = vpop.trf.xlu0  ;;  %845 = vst.msk [vmem:[#allocation2 + $0x18] sm:$0xff] %vm841_vm1, %v836_v62 }
 0x272   : > { %1045 = vxpose.xlu0.b32.start [1/2] (short) (narrow) %v1029_v63, 16  ;;  %v825_v0 = vpop.trf.xlu1 }
 0x275   : > { %v1030_v1 = vpop.trf.xlu0 }
 0x276   : > { %1046 = vxpose.xlu0.b32.end [2/2] (short) (narrow) %v1030_v1, 16  ;;  %v826_v2 = vpop.trf.xlu1 }
 0x277   : > { %v837_v3 = vpack.c.bf16 %v826_v2, %v825_v0 }
 0x278   : > { %v1312_v39 = vld [vmem:[#allocation2 + $0x18] sm:$0xff] }
 0x279   : > { %v1031_v4 = vpop.trf.xlu0  ;;  %846 = vst.msk [vmem:[#allocation2 + $0x20] sm:$0xff] %vm841_vm1, %v837_v3 }
 0x27a   : > { %1077 = vxpose.xlu1.b32.start [1/2] (short) (narrow) %v1031_v4, 16  ;;  %v827_v5 = vpop.trf.xlu1 }
 0x27d   : > { %v1032_v6 = vpop.trf.xlu0 }
 0x27e   : > { %1078 = vxpose.xlu1.b32.end [2/2] (short) (narrow) %v1032_v6, 16  ;;  %v828_v7 = vpop.trf.xlu1 }
 0x27f   : > { %v838_v8 = vpack.c.bf16 %v828_v7, %v827_v5 }
 0x280   : > { %v1313_v43 = vld [vmem:[#allocation2 + $0x20] sm:$0xff] }
 0x281   : > { %v1033_v9 = vpop.trf.xlu0  ;;  %847 = vst.msk [vmem:[#allocation2 + $0x28] sm:$0xff] %vm841_vm1, %v838_v8 }
 0x282   : > { %1109 = vxpose.xlu0.b32.start [1/2] (short) (narrow) %v1033_v9, 16  ;;  %v829_v10 = vpop.trf.xlu1 }
 0x285   : > { %v1034_v11 = vpop.trf.xlu0 }
 0x286   : > { %1110 = vxpose.xlu0.b32.end [2/2] (short) (narrow) %v1034_v11, 16  ;;  %v830_v12 = vpop.trf.xlu1 }
 0x287   : > { %v839_v13 = vpack.c.bf16 %v830_v12, %v829_v10 }
 0x288   : > { %v1314_v49 = vld [vmem:[#allocation2 + $0x28] sm:$0xff] }
 0x289   : > { %v1035_v14 = vpop.trf.xlu0  ;;  %848 = vst.msk [vmem:[#allocation2 + $0x30] sm:$0xff] %vm841_vm1, %v839_v13 }
 0x28a   : > { %1141 = vxpose.xlu1.b32.start [1/2] (short) (narrow) %v1035_v14, 16  ;;  %v831_v16 = vpop.trf.xlu1 }
 0x28d   : > { %v1036_v17 = vpop.trf.xlu0 }
 0x28e   : > { %1142 = vxpose.xlu1.b32.end [2/2] (short) (narrow) %v1036_v17, 16  ;;  %v832_v18 = vpop.trf.xlu1 }
 0x28f   : > { %v840_v19 = vpack.c.bf16 %v832_v18, %v831_v16 }
 0x290   : > { %v1315_v55 = vld [vmem:[#allocation2 + $0x30] sm:$0xff] }
 0x291   : > { %v1037_v20 = vpop.trf.xlu0  ;;  %849 = vst.msk [vmem:[#allocation2 + $0x38] sm:$0xff] %vm841_vm1, %v840_v19 }
 0x292   : > { %1173 = vxpose.xlu0.b32.start [1/2] (short) (narrow) %v1037_v20, 16 }
 0x295   : > { %v1038_v21 = vpop.trf.xlu0 }
 0x296   : > { %1174 = vxpose.xlu0.b32.end [2/2] (short) (narrow) %v1038_v21, 16 }
 0x298   : > { %v1316_v59 = vld [vmem:[#allocation2 + $0x38] sm:$0xff] }
 0x299   : > { %v1039_v22 = vpop.trf.xlu0 }
 0x29a   : > { %1205 = vxpose.xlu1.b32.start [1/2] (short) (narrow) %v1039_v22, 16 }
 0x29d   : > { %v1040_v23 = vpop.trf.xlu0 }
 0x29e   : > { %1206 = vxpose.xlu1.b32.end [2/2] (short) (narrow) %v1040_v23, 16 }
 0x2a1   : > { %v1041_v24 = vpop.trf.xlu0 }
 0x2a2   : > { %1237 = vxpose.xlu0.b32.start [1/2] (short) (narrow) %v1041_v24, 16 }
 0x2a5   : > { %v1042_v25 = vpop.trf.xlu0 }
 0x2a6   : > { %1238 = vxpose.xlu0.b32.end [2/2] (short) (narrow) %v1042_v25, 16 }
 0x2a9   : > { %v1043_v26 = vpop.trf.xlu0 }
 0x2aa   : > { %1269 = vxpose.xlu1.b32.start [1/2] (short) (narrow) %v1043_v26, 16 }
 0x2ad   : > { %v1044_v27 = vpop.trf.xlu0 }
 0x2ae   : > { %1270 = vxpose.xlu1.b32.end [2/2] (short) (narrow) %v1044_v27, 16 }
 0x2f2   : > { %v1061_v28 = vpop.trf.xlu0 }
 0x2f6   : > { %v1062_v29 = vpop.trf.xlu0 }
 0x2f7   : > { %v1301_v30 = vpack.c.bf16 %v1062_v29, %v1061_v28 }
 0x2f9   : > { %3066 = vmatmul.mubr.msk.bf16.vlgmr.msra.gmra.mrb[4].mxu1 %vm1325_vm2, %v1301_v30 }
 0x2fa   : > { %3070 = vmatpush3.bf16.msra.mxu1 %v1310_v31  ;;  %v1093_v32 = vpop.trf.xlu1  ;;  %3071 = vmatprep.mubr.msk.bf16.mxu1 %vm3680_vm0, %v3679_v15 }
 0x2fb   : > { %3075 = vmatprep.subr.bf16.mxu1 %v3679_v15 }
 0x2fe   : > { %v1094_v33 = vpop.trf.xlu1 }
 0x2ff   : > { %v1302_v34 = vpack.c.bf16 %v1094_v33, %v1093_v32 }
 0x301   : > { %3072 = vmatmul.mubr.msk.bf16.vlgmr.msra.gmra.mrb[8].mxu1 %vm1325_vm2, %v1302_v34 }
 0x302   : > { %3076 = vmatpush3.bf16.msra.mxu1 %v1311_v35  ;;  %v1125_v36 = vpop.trf.xlu0  ;;  %3077 = vmatprep.mubr.msk.bf16.mxu1 %vm3680_vm0, %v3679_v15 }
 0x303   : > { %3081 = vmatprep.subr.bf16.mxu1 %v3679_v15 }
 0x306   : > { %v1126_v37 = vpop.trf.xlu0 }
 0x307   : > { %v1303_v38 = vpack.c.bf16 %v1126_v37, %v1125_v36 }
 0x309   : > { %3078 = vmatmul.mubr.msk.bf16.vlgmr.msra.gmra.mrb[12].mxu1 %vm1325_vm2, %v1303_v38 }
 0x30a   : > { %3082 = vmatpush3.bf16.msra.mxu1 %v1312_v39  ;;  %v1157_v40 = vpop.trf.xlu1  ;;  %3083 = vmatprep.mubr.msk.bf16.mxu1 %vm3680_vm0, %v3679_v15 }
 0x30b   : > { %3087 = vmatprep.subr.bf16.mxu1 %v3679_v15 }
 0x30e   : > { %v1158_v41 = vpop.trf.xlu1 }
 0x30f   : > { %v1304_v42 = vpack.c.bf16 %v1158_v41, %v1157_v40 }
 0x311   : > { %3084 = vmatmul.mubr.msk.bf16.vlgmr.msra.gmra.mrb[16].mxu1 %vm1325_vm2, %v1304_v42 }
 0x312   : > { %3088 = vmatpush3.bf16.msra.mxu1 %v1313_v43  ;;  %v1189_v44 = vpop.trf.xlu0  ;;  %3089 = vmatprep.mubr.msk.bf16.mxu1 %vm3680_vm0, %v3679_v15 }
 0x313   : > { %3093 = vmatprep.subr.bf16.mxu1 %v3679_v15 }
 0x316   : > { %v1190_v45 = vpop.trf.xlu0 }
 0x317   : > { %v1305_v46 = vpack.c.bf16 %v1190_v45, %v1189_v44 }
 0x319   : > { %3090 = vmatmul.mubr.msk.bf16.vlgmr.msra.gmra.mrb[20].mxu1 %vm1325_vm2, %v1305_v46 }
 0x31a   : > { %3094 = vmatpush3.bf16.msra.mxu1 %v1314_v49  ;;  %v1221_v51 = vpop.trf.xlu1  ;;  %3095 = vmatprep.mubr.msk.bf16.mxu1 %vm3680_vm0, %v3679_v15 }
 0x31b   : > { %3099 = vmatprep.subr.bf16.mxu1 %v3679_v15 }
 0x31e   : > { %v1222_v53 = vpop.trf.xlu1 }
 0x31f   : > { %v1306_v54 = vpack.c.bf16 %v1222_v53, %v1221_v51 }
 0x321   : > { %3096 = vmatmul.mubr.msk.bf16.vlgmr.msra.gmra.mrb[24].mxu1 %vm1325_vm2, %v1306_v54 }
 0x322   : > { %3100 = vmatpush3.bf16.msra.mxu1 %v1315_v55  ;;  %v1253_v56 = vpop.trf.xlu0  ;;  %3101 = vmatprep.mubr.msk.bf16.mxu1 %vm3680_vm0, %v3679_v15 }
 0x323   : > { %3105 = vmatprep.subr.bf16.mxu1 %v3679_v15 }
 0x326   : > { %v1254_v57 = vpop.trf.xlu0 }
 0x327   : > { %v1307_v58 = vpack.c.bf16 %v1254_v57, %v1253_v56 }
 0x329   : > { %3102 = vmatmul.mubr.msk.bf16.vlgmr.msra.gmra.mrb[28].mxu1 %vm1325_vm2, %v1307_v58 }
 0x32a   : > { %3106 = vmatpush3.bf16.msra.mxu1 %v1316_v59  ;;  %v1285_v60 = vpop.trf.xlu1  ;;  %3107 = vmatprep.mubr.msk.bf16.mxu1 %vm3680_vm0, %v3679_v15 }
 0x32b   : > { %3117 = vmatprep.subr.bf16.mxu1 %v3679_v15 }
 0x32e   : > { %v1286_v61 = vpop.trf.xlu1 }
 0x32f   : > { %v1308_v62 = vpack.c.bf16 %v1286_v61, %v1285_v60 }
 0x331   : > { %3108 = vmatmul.mubr.msk.bf16.vlgmr.msra.gmra.mrb[32].mxu1 %vm1325_vm2, %v1308_v62 }
 0x332   : > { %3119 = vmatprep.mubr.msk.bf16.mxu1 %vm3680_vm0, %v3679_v15 }
 0x3cc   : > { %v4141_v63 = vpop.f32.mrb[4].mxu1 }
 0x3cd   : > { %v3067_v0 = vpop.f32.mrb[5].mxu1  ;;  %v1679_v1 = vsel %vm841_vm1, %v4141_v63, -inf }
 0x3ce   : > { %1680 = vmax.xlane.f32.xlu0 %v1679_v1  ;;  %v4145_v2 = vpop.f32.mrb[6].mxu1 }
 0x3cf   : > { %v3068_v3 = vpop.f32.mrb[7].mxu1  ;;  %v1682_v4 = vsel %vm841_vm1, %v4145_v2, -inf }
 0x3d0   : > { %1683 = vmax.xlane.f32.xlu1 %v1682_v4 }
 0x3d4   : > { %v4149_v5 = vpop.f32.mrb[8].mxu1 }
 0x3d5   : > { %v3073_v6 = vpop.f32.mrb[9].mxu1  ;;  %v1685_v7 = vsel %vm841_vm1, %v4149_v5, -inf }
 0x3d6   : > { %1686 = vmax.xlane.f32.xlu1 %v1685_v7  ;;  %v4153_v8 = vpop.f32.mrb[10].mxu1 }
 0x3d7   : > { %v3074_v9 = vpop.f32.mrb[11].mxu1  ;;  %v1688_v10 = vsel %vm841_vm1, %v4153_v8, -inf }
 0x3da   : > { %1689 = vmax.xlane.f32.xlu1 %v1688_v10 }
 0x3dc   : > { %v4157_v11 = vpop.f32.mrb[12].mxu1 }
 0x3dd   : > { %v3079_v12 = vpop.f32.mrb[13].mxu1  ;;  %v1691_v13 = vsel %vm841_vm1, %v4157_v11, -inf }
 0x3de   : > { %1692 = vmax.xlane.f32.xlu0 %v1691_v13  ;;  %v4161_v14 = vpop.f32.mrb[14].mxu1 }
 0x3df   : > { %v3080_v16 = vpop.f32.mrb[15].mxu1  ;;  %v1694_v17 = vsel %vm841_vm1, %v4161_v14, -inf }
 0x3e0   : > { %1695 = vmax.xlane.f32.xlu1 %v1694_v17 }
 0x3e4   : > { %v4165_v18 = vpop.f32.mrb[16].mxu1 }
 0x3e5   : > { %v3085_v19 = vpop.f32.mrb[17].mxu1  ;;  %v1697_v20 = vsel %vm841_vm1, %v4165_v18, -inf }
 0x3e6   : > { %1698 = vmax.xlane.f32.xlu0 %v1697_v20  ;;  %v4169_v21 = vpop.f32.mrb[18].mxu1 }
 0x3e7   : > { %v3086_v22 = vpop.f32.mrb[19].mxu1  ;;  %v1700_v23 = vsel %vm841_vm1, %v4169_v21, -inf }
 0x3e8   : > { %1701 = vmax.xlane.f32.xlu1 %v1700_v23 }
 0x3ec   : > { %v4173_v24 = vpop.f32.mrb[20].mxu1 }
 0x3ed   : > { %v3091_v25 = vpop.f32.mrb[21].mxu1  ;;  %v1703_v26 = vsel %vm841_vm1, %v4173_v24, -inf }
 0x3ee   : > { %1704 = vmax.xlane.f32.xlu0 %v1703_v26  ;;  %v4177_v27 = vpop.f32.mrb[22].mxu1 }
 0x3ef   : > { %v3092_v28 = vpop.f32.mrb[23].mxu1  ;;  %v1706_v29 = vsel %vm841_vm1, %v4177_v27, -inf }
 0x3f0   : > { %1707 = vmax.xlane.f32.xlu1 %v1706_v29 }
 0x3f4   : > { %v4181_v30 = vpop.f32.mrb[24].mxu1 }
 0x3f5   : > { %v3097_v31 = vpop.f32.mrb[25].mxu1  ;;  %v1709_v32 = vsel %vm841_vm1, %v4181_v30, -inf }
 0x3f6   : > { %1710 = vmax.xlane.f32.xlu0 %v1709_v32  ;;  %v4185_v33 = vpop.f32.mrb[26].mxu1 }
 0x3f7   : > { %v3098_v34 = vpop.f32.mrb[27].mxu1  ;;  %v1712_v35 = vsel %vm841_vm1, %v4185_v33, -inf }
 0x3f8   : > { %1713 = vmax.xlane.f32.xlu1 %v1712_v35 }
 0x3fc   : > { %v4189_v36 = vpop.f32.mrb[28].mxu1 }
 0x3fd   : > { %v3103_v37 = vpop.f32.mrb[29].mxu1  ;;  %v1715_v38 = vsel %vm841_vm1, %v4189_v36, -inf }
 0x3fe   : > { %1716 = vmax.xlane.f32.xlu0 %v1715_v38  ;;  %v4193_v39 = vpop.f32.mrb[30].mxu1 }
 0x3ff   : > { %v3104_v40 = vpop.f32.mrb[31].mxu1  ;;  %v1718_v41 = vsel %vm841_vm1, %v4193_v39, -inf }
 0x400   : > { %1719 = vmax.xlane.f32.xlu1 %v1718_v41 }
 0x404   : > { %v4197_v42 = vpop.f32.mrb[32].mxu1 }
 0x405   : > { %v3109_v43 = vpop.f32.mrb[33].mxu1  ;;  %v1721_v44 = vsel %vm841_vm1, %v4197_v42, -inf }
 0x406   : > { %1722 = vmax.xlane.f32.xlu0 %v1721_v44  ;;  %v4201_v45 = vpop.f32.mrb[34].mxu1 }
 0x407   : > { %v3110_v46 = vpop.f32.mrb[35].mxu1  ;;  %v1724_v49 = vsel %vm841_vm1, %v4201_v45, -inf }
 0x408   : > { %1725 = vmax.xlane.f32.xlu1 %v1724_v49 }
 0x45b   : > { %v1681_v51 = vpop.xlane.xlu0 %1680 }
 0x45c   : > { %v1727_v53 = vsub.f32 %v4141_v63, %v1681_v51 }
 0x45d   : > { %v1684_v54 = vpop.xlane.xlu1 %1683 }
 0x45e   : > { %v1743_v55 = vmul.f32 1.442695, %v1727_v53  ;;  %v1728_v56 = vsub.f32 %v4145_v2, %v1684_v54 }
 0x460   : > { %3327 = vpow2.f32 %v1743_v55  ;;  %v1745_v57 = vmul.f32 1.442695, %v1728_v56 }
 0x462   : > { %3329 = vpow2.f32 %v1745_v57 }
 0x463   : > { %v1687_v58 = vpop.xlane.xlu1 %1686 }
 0x464   : > { %v1729_v59 = vsub.f32 %v4149_v5, %v1687_v58 }
 0x466   : > { %v1747_v60 = vmul.f32 1.442695, %v1729_v59 }
 0x467   : > { %v1690_v61 = vpop.xlane.xlu1 %1689 }
 0x468   : > { %3331 = vpow2.f32 %v1747_v60  ;;  %v1730_v62 = vsub.f32 %v4153_v8, %v1690_v61 }
 0x46a   : > { %v4209_v0 = vpop.eup %3327  ;;  %v1749_v1 = vmul.f32 1.442695, %v1730_v62 }
 0x46b   : > { %v1693_v3 = vpop.xlane.xlu0 %1692  ;;  %v1775_v63 = vsel %vm841_vm1, %v4209_v0, 0.0 }
 0x46c   : > { %v4213_v4 = vpop.eup %3329  ;;  %3333 = vpow2.f32 %v1749_v1  ;;  %v1731_v2 = vsub.f32 %v4157_v11, %v1693_v3  ;;  %1776 = vadd.xlane.f32.xlu0 %v1775_v63 }
 0x46d   : > { %v1696_v6 = vpop.xlane.xlu1 %1695  ;;  %v1778_v5 = vsel %vm841_vm1, %v4213_v4, 0.0 }
 0x46e   : > { %v1751_v7 = vmul.f32 1.442695, %v1731_v2  ;;  %v1732_v8 = vsub.f32 %v4161_v14, %v1696_v6  ;;  %1779 = vadd.xlane.f32.xlu1 %v1778_v5 }
 0x470   : > { %3335 = vpow2.f32 %v1751_v7  ;;  %v1753_v9 = vmul.f32 1.442695, %v1732_v8 }
 0x472   : > { %v4219_v10 = vpop.eup %3331  ;;  %3337 = vpow2.f32 %v1753_v9 }
 0x473   : > { %v1699_v12 = vpop.xlane.xlu0 %1698  ;;  %v1781_v13 = vsel %vm841_vm1, %v4219_v10, 0.0 }
 0x474   : > { %v1733_v11 = vsub.f32 %v4165_v18, %v1699_v12  ;;  %1782 = vadd.xlane.f32.xlu0 %v1781_v13  ;;  %v2880_v13 = vld [vmem:[%s4491_s15] ss:$0 sm:$0xff]  ;;  %s2686_s15 = scalar_lea.sflag [#allocation6], %s4029_s4 }
 0x475   : > { %v1702_v16 = vpop.xlane.xlu1 %1701 }
 0x476   : > { %v4224_v17 = vpop.eup %3333  ;;  %v1755_v19 = vmul.f32 1.442695, %v1733_v11  ;;  %v1734_v20 = vsub.f32 %v4169_v21, %v1702_v16  ;;  %v787_v11 = vadd.f32 %v2880_v13, %v4120_v48  ;;  %v790_v16 = vadd.f32 %v2880_v13, %v4127_v52 }
 0x477   : > { %v1784_v14 = vsel %vm841_vm1, %v4224_v17, 0.0 }
 0x478   : > { %3339 = vpow2.f32 %v1755_v19  ;;  %v1757_v22 = vmul.f32 1.442695, %v1734_v20  ;;  %1785 = vadd.xlane.f32.xlu1 %v1784_v14  ;;  %v795_v19 = vadd.f32 %v4118_v47, %v2880_v13  ;;  %v798_v20 = vadd.f32 %v4123_v50, %v2880_v13 }
 0x47a   : > { %v4229_v23 = vpop.eup %3335  ;;  %3341 = vpow2.f32 %v1757_v22 }
 0x47b   : > { %v1705_v25 = vpop.xlane.xlu0 %1704  ;;  %v1787_v18 = vsel %vm841_vm1, %v4229_v23, 0.0 }
 0x47c   : > { %v4233_v26 = vpop.eup %3337  ;;  %v1735_v28 = vsub.f32 %v4173_v24, %v1705_v25  ;;  %1788 = vadd.xlane.f32.xlu0 %v1787_v18 }
 0x47d   : > { %v1708_v29 = vpop.xlane.xlu1 %1707  ;;  %v1790_v21 = vsel %vm841_vm1, %v4233_v26, 0.0 }
 0x47e   : > { %v1759_v31 = vmul.f32 1.442695, %v1735_v28  ;;  %v1736_v32 = vsub.f32 %v4177_v27, %v1708_v29  ;;  %1791 = vadd.xlane.f32.xlu1 %v1790_v21 }
 0x480   : > { %3343 = vpow2.f32 %v1759_v31  ;;  %v1761_v34 = vmul.f32 1.442695, %v1736_v32 }
 0x482   : > { %v4239_v35 = vpop.eup %3339  ;;  %3345 = vpow2.f32 %v1761_v34 }
 0x483   : > { %v1711_v37 = vpop.xlane.xlu0 %1710  ;;  %v1793_v38 = vsel %vm841_vm1, %v4239_v35, 0.0 }
 0x484   : > { %v4243_v40 = vpop.eup %3341  ;;  %v1737_v24 = vsub.f32 %v4181_v30, %v1711_v37  ;;  %1794 = vadd.xlane.f32.xlu0 %v1793_v38 }
 0x485   : > { %v1714_v41 = vpop.xlane.xlu1 %1713  ;;  %v1796_v43 = vsel %vm841_vm1, %v4243_v40, 0.0 }
 0x486   : > { %v1763_v27 = vmul.f32 1.442695, %v1737_v24  ;;  %v1738_v44 = vsub.f32 %v4185_v33, %v1714_v41  ;;  %1797 = vadd.xlane.f32.xlu1 %v1796_v43 }
 0x488   : > { %3347 = vpow2.f32 %v1763_v27  ;;  %v1765_v46 = vmul.f32 1.442695, %v1738_v44 }
 0x48a   : > { %v4249_v49 = vpop.eup %3343  ;;  %3349 = vpow2.f32 %v1765_v46 }
 0x48b   : > { %v1717_v51 = vpop.xlane.xlu0 %1716  ;;  %v1799_v53 = vsel %vm841_vm1, %v4249_v49, 0.0 }
 0x48c   : > { %v4253_v54 = vpop.eup %3345  ;;  %v1739_v30 = vsub.f32 %v4189_v36, %v1717_v51  ;;  %1800 = vadd.xlane.f32.xlu0 %v1799_v53 }
 0x48d   : > { %v1720_v55 = vpop.xlane.xlu1 %1719  ;;  %v1802_v56 = vsel %vm841_vm1, %v4253_v54, 0.0 }
 0x48e   : > { %v1767_v33 = vmul.f32 1.442695, %v1739_v30  ;;  %v1740_v57 = vsub.f32 %v4193_v39, %v1720_v55  ;;  %1803 = vadd.xlane.f32.xlu1 %v1802_v56 }
 0x490   : > { %3351 = vpow2.f32 %v1767_v33  ;;  %v1769_v58 = vmul.f32 1.442695, %v1740_v57 }
 0x492   : > { %v4259_v59 = vpop.eup %3347  ;;  %3353 = vpow2.f32 %v1769_v58 }
 0x493   : > { %v1723_v60 = vpop.xlane.xlu0 %1722  ;;  %v1805_v61 = vsel %vm841_vm1, %v4259_v59, 0.0 }
 0x494   : > { %v4263_v62 = vpop.eup %3349  ;;  %v1741_v36 = vsub.f32 %v4197_v42, %v1723_v60  ;;  %1806 = vadd.xlane.f32.xlu0 %v1805_v61 }
 0x495   : > { %v1726_v1 = vpop.xlane.xlu1 %1725  ;;  %v1808_v3 = vsel %vm841_vm1, %v4263_v62, 0.0 }
 0x496   : > { %v1771_v39 = vmul.f32 1.442695, %v1741_v36  ;;  %v1742_v63 = vsub.f32 %v4201_v45, %v1726_v1  ;;  %1809 = vadd.xlane.f32.xlu1 %v1808_v3 }
 0x498   : > { %3355 = vpow2.f32 %v1771_v39  ;;  %v1773_v2 = vmul.f32 1.442695, %v1742_v63 }
 0x49a   : > { %v4269_v6 = vpop.eup %3351  ;;  %3357 = vpow2.f32 %v1773_v2 }
 0x49b   : > { %v1811_v5 = vsel %vm841_vm1, %v4269_v6, 0.0 }
 0x49c   : > { %v4273_v7 = vpop.eup %3353  ;;  %1812 = vadd.xlane.f32.xlu0 %v1811_v5 }
 0x49d   : > { %v1814_v42 = vsel %vm841_vm1, %v4273_v7, 0.0 }
 0x49e   : > { %1815 = vadd.xlane.f32.xlu1 %v1814_v42 }
 0x4a2   : > { %v4277_v8 = vpop.eup %3355 }
 0x4a3   : > { %v1817_v45 = vsel %vm841_vm1, %v4277_v8, 0.0 }
 0x4a4   : > { %v4281_v9 = vpop.eup %3357  ;;  %1818 = vadd.xlane.f32.xlu0 %v1817_v45 }
 0x4a5   : > { %v1820_v12 = vsel %vm841_vm1, %v4281_v9, 0.0 }
 0x4a6   : > { %1821 = vadd.xlane.f32.xlu1 %v1820_v12 }
 0x4d1   : > { %850 = vxpose.xlu0.b32.start [1/4] (short) %v787_v11, 128 }
 0x4d5   : > { %851 = vxpose.xlu0.b32.cont [2/4] (short) %v790_v16, 128 }
 0x4d9   : > { %852 = vxpose.xlu0.b32.cont [3/4] (short) %v795_v19, 128 }
 0x4dd   : > { %853 = vxpose.xlu0.b32.end [4/4] (short) %v798_v20, 128 }
 0x4f9   : > { %v1777_v14 = vpop.xlane.xlu0 %1776 }
 0x4fb   : > { %v1780_v31 = vpop.xlane.xlu1 %1779 }
 0x4fc   : > { %3359 = vrcp.f32 %v1780_v31 }
 0x4fd   : > { %3361 = vrcp.f32 %v1777_v14 }
 0x501   : > { %v1783_v22 = vpop.xlane.xlu0 %1782 }
 0x505   : > { %v1786_v34 = vpop.xlane.xlu1 %1785 }
 0x506   : > { %3363 = vrcp.f32 %v1786_v34  ;;  %v3360_v24 = vpop.eup %3359 }
 0x507   : > { %3365 = vrcp.f32 %v1783_v22  ;;  %v3362_v27 = vpop.eup %3361  ;;  %v1840_v46 = vmul.f32 %v3360_v24, %v4213_v4 }
 0x508   : > { %v1839_v53 = vmul.f32 %v3362_v27, %v4209_v0 }
 0x509   : > { %v1789_v25 = vpop.xlane.xlu0 %1788 }
 0x50a   : > { %v1855_v56 = vpack.c.bf16 %v1840_v46, %v1839_v53 }
 0x50b   : > { %v1792_v51 = vpop.xlane.xlu1 %1791 }
 0x50c   : > { %3367 = vrcp.f32 %v1792_v51 }
 0x50d   : > { %3369 = vrcp.f32 %v1789_v25 }
 0x510   : > { %v3364_v33 = vpop.eup %3363 }
 0x511   : > { %v1795_v18 = vpop.xlane.xlu0 %1794  ;;  %v3366_v60 = vpop.eup %3365  ;;  %v1842_v0 = vmul.f32 %v3364_v33, %v4224_v17 }
 0x512   : > { %v1841_v36 = vmul.f32 %v3366_v60, %v4219_v10 }
 0x513   : > { %v1798_v61 = vpop.xlane.xlu1 %1797 }
 0x514   : > { %3371 = vrcp.f32 %v1798_v61  ;;  %v1856_v39 = vpack.c.bf16 %v1842_v0, %v1841_v36 }
 0x515   : > { %3373 = vrcp.f32 %v1795_v18 }
 0x516   : > { %v3368_v63 = vpop.eup %3367 }
 0x517   : > { %v3370_v42 = vpop.eup %3369  ;;  %v1844_v10 = vmul.f32 %v3368_v63, %v4233_v26 }
 0x518   : > { %v1843_v12 = vmul.f32 %v3370_v42, %v4229_v23 }
 0x519   : > { %v4292_v28 = vpop.xlane.xlu0 %1800 }
 0x51a   : > { %v1857_v16 = vpack.c.bf16 %v1844_v10, %v1843_v12 }
 0x51b   : > { %v1804_v45 = vpop.xlane.xlu1 %1803 }
 0x51c   : > { %3375 = vrcp.f32 %v1804_v45 }
 0x51d   : > { %3377 = vrcp.f32 %v4292_v28 }
 0x51e   : > { %v3372_v19 = vpop.eup %3371 }
 0x51f   : > { %v3374_v26 = vpop.eup %3373  ;;  %v1846_v23 = vmul.f32 %v3372_v19, %v4243_v40 }
 0x520   : > { %v1845_v18 = vmul.f32 %v3374_v26, %v4239_v35 }
 0x521   : > { %v4294_v29 = vpop.xlane.xlu0 %1806 }
 0x522   : > { %v1858_v31 = vpack.c.bf16 %v1846_v23, %v1845_v18 }
 0x523   : > { %v1810_v25 = vpop.xlane.xlu1 %1809 }
 0x524   : > { %3379 = vrcp.f32 %v1810_v25 }
 0x525   : > { %3381 = vrcp.f32 %v4294_v29 }
 0x529   : > { %v4296_v21 = vpop.xlane.xlu0 %1812 }
 0x531   : > { %v4298_v48 = vpop.xlane.xlu0 %1818 }
 0x551   : > { %v866_v52 = vpop.trf.xlu0 }
 0x555   : > { %v867_v47 = vpop.trf.xlu0 }
 0x556   : > { %v882_v32 = vpack.c.bf16 %v867_v47, %v866_v52  ;;  %v3376_v47 = vpop.eup %3375 }
 0x557   : > { %v3378_v40 = vpop.eup %3377  ;;  %v1848_v35 = vmul.f32 %v3376_v47, %v4253_v54 }
 0x558   : > { %890 = vst.msk [vmem:[#allocation3] sm:$0xff] %vm841_vm1, %v882_v32  ;;  %v1847_v29 = vmul.f32 %v3378_v40, %v4249_v49 }
 0x559   : > { %v868_v50 = vpop.trf.xlu0 }
 0x55d   : > { %v869_v37 = vpop.trf.xlu0 }
 0x55e   : > { %v883_v38 = vpack.c.bf16 %v869_v37, %v868_v50  ;;  %v1816_v37 = vpop.xlane.xlu1 %1815 }
 0x55f   : > { %v1317_v41 = vld [vmem:[#allocation3] sm:$0xff]  ;;  %3383 = vrcp.f32 %v1816_v37  ;;  %v3320_v37 = vld [vmem:[#allocation13 + $0x8] sm:$0xff]  }
 0x560   : > { %891 = vst.msk [vmem:[#allocation3 + $0x8] sm:$0xff] %vm841_vm1, %v883_v38  ;;  %v1867_v43 = vsel %vm841_vm1, %v1317_v41, 0  ;;  %v1859_v41 = vpack.c.bf16 %v1848_v35, %v1847_v29  ;;  %3385 = vrcp.f32 %v4296_v21  ;;  %v3319_v35 = vld [vmem:[#allocation13] sm:$0xff]   ;;  %v3321_v29 = vld [vmem:[#allocation13 + $0x10] sm:$0xff]  }
 0x561   : > { %3112 = vmatpush3.bf16.xpose.msra.mxu0 %v1867_v43  ;;  %v870_v44 = vpop.trf.xlu0  ;;  %v3380_v43 = vpop.eup %3379 }
 0x562   : > { %3123 = vmatprep.subr.bf16.mxu0 %v3679_v15  ;;  %v3382_v54 = vpop.eup %3381  ;;  %v1850_v49 = vmul.f32 %v3380_v43, %v4263_v62  ;;  %v1822_v51 = vpop.xlane.xlu1 %1821  ;;  %v3325_v43 = vld [vmem:[#allocation13 + $0x30] sm:$0xff]  }
 0x563   : > { %v1849_v21 = vmul.f32 %v3382_v54, %v4259_v59  ;;  %3387 = vrcp.f32 %v1822_v51 }
 0x564   : > { %3389 = vrcp.f32 %v4298_v48 }
 0x565   : > { %v871_v30 = vpop.trf.xlu0 }
 0x566   : > { %v884_v55 = vpack.c.bf16 %v871_v30, %v870_v44 }
 0x567   : > { %v1318_v57 = vld [vmem:[#allocation3 + $0x8] sm:$0xff] }
 0x568   : > { %892 = vst.msk [vmem:[#allocation3 + $0x10] sm:$0xff] %vm841_vm1, %v884_v55  ;;  %3114 = vmatmul.mubr.msk.bf16.vlgmr.msra.gmra.mrb[8].mxu0 %vm841_vm1, %v1855_v56  ;;  %v1914_v58 = vsel %vm841_vm1, %v1318_v57, 0  ;;  %v1860_v55 = vpack.c.bf16 %v1850_v49, %v1849_v21 }
 0x569   : > { %3118 = vmatpush3.bf16.xpose.msra.mxu1 %v1914_v58  ;;  %v872_v4 = vpop.trf.xlu0  ;;  %3125 = vmatprep.mubr.msk.bf16.mxu0 %vm3680_vm0, %v3679_v15  ;;  %v3384_v56 = vpop.eup %3383 }
 0x56a   : > { %3129 = vmatprep.subr.bf16.mxu1 %v3679_v15  ;;  %v3386_v62 = vpop.eup %3385  ;;  %v1852_v59 = vmul.f32 %v3384_v56, %v4273_v7 }
 0x56b   : > { %v1851_v58 = vmul.f32 %v3386_v62, %v4269_v6 }
 0x56d   : > { %v873_v1 = vpop.trf.xlu0  ;;  %v1861_v60 = vpack.c.bf16 %v1852_v59, %v1851_v58  ;;  %v3388_v48 = vpop.eup %3387 }
 0x56e   : > { %v885_v3 = vpack.c.bf16 %v873_v1, %v872_v4  ;;  %v3390_v61 = vpop.eup %3389  ;;  %v1854_v36 = vmul.f32 %v3388_v48, %v4281_v9 }
 0x56f   : > { %v1319_v2 = vld [vmem:[#allocation3 + $0x10] sm:$0xff]  ;;  %v1853_v7 = vmul.f32 %v3390_v61, %v4277_v8 }
 0x570   : > { %893 = vst.msk [vmem:[#allocation3 + $0x18] sm:$0xff] %vm841_vm1, %v885_v3  ;;  %3120 = vmatmul.mubr.msk.bf16.vlgmr.msra.gmra.mrb[36].mxu1 %vm841_vm1, %v1856_v39  ;;  %v1961_v5 = vsel %vm841_vm1, %v1319_v2, 0 }
 0x571   : > { %v874_v17 = vpop.trf.xlu0  ;;  %3124 = vmatpush3.bf16.xpose.msra.mxu0 %v1961_v5  ;;  %3131 = vmatprep.mubr.msk.bf16.mxu1 %vm3680_vm0, %v3679_v15  ;;  %v1862_v1 = vpack.c.bf16 %v1854_v36, %v1853_v7 }
 0x572   : > { %3135 = vmatprep.subr.bf16.mxu0 %v3679_v15 }
 0x575   : > { %v875_v13 = vpop.trf.xlu0 }
 0x576   : > { %v886_v11 = vpack.c.bf16 %v875_v13, %v874_v17 }
 0x577   : > { %v1320_v20 = vld [vmem:[#allocation3 + $0x18] sm:$0xff] }
 0x578   : > { %894 = vst.msk [vmem:[#allocation3 + $0x20] sm:$0xff] %vm841_vm1, %v886_v11  ;;  %3126 = vmatmul.mubr.msk.bf16.vlgmr.msra.gmra.mrb[12].mxu0 %vm841_vm1, %v1857_v16  ;;  %v2008_v14 = vsel %vm841_vm1, %v1320_v20, 0 }
 0x579   : > { %v876_v22 = vpop.trf.xlu0  ;;  %3130 = vmatpush3.bf16.xpose.msra.mxu1 %v2008_v14  ;;  %3137 = vmatprep.mubr.msk.bf16.mxu0 %vm3680_vm0, %v3679_v15 }
 0x57a   : > { %3141 = vmatprep.subr.bf16.mxu1 %v3679_v15 }
 0x57d   : > { %v877_v28 = vpop.trf.xlu0 }
 0x57e   : > { %v887_v52 = vpack.c.bf16 %v877_v28, %v876_v22 }
 0x57f   : > { %v1321_v32 = vld [vmem:[#allocation3 + $0x20] sm:$0xff] }
 0x580   : > { %895 = vst.msk [vmem:[#allocation3 + $0x28] sm:$0xff] %vm841_vm1, %v887_v52  ;;  %3132 = vmatmul.mubr.msk.bf16.vlgmr.msra.gmra.mrb[40].mxu1 %vm841_vm1, %v1858_v31  ;;  %v2055_v50 = vsel %vm841_vm1, %v1321_v32, 0 }
 0x581   : > { %v878_v34 = vpop.trf.xlu0  ;;  %3136 = vmatpush3.bf16.xpose.msra.mxu0 %v2055_v50  ;;  %3143 = vmatprep.mubr.msk.bf16.mxu1 %vm3680_vm0, %v3679_v15 }
 0x582   : > { %3147 = vmatprep.subr.bf16.mxu0 %v3679_v15 }
 0x585   : > { %v879_v38 = vpop.trf.xlu0 }
 0x586   : > { %v888_v24 = vpack.c.bf16 %v879_v38, %v878_v34  ;;  %v3322_v38 = vld [vmem:[#allocation13 + $0x18] sm:$0xff]  }
 0x587   : > { %v1322_v27 = vld [vmem:[#allocation3 + $0x28] sm:$0xff] }
 0x588   : > { %896 = vst.msk [vmem:[#allocation3 + $0x30] sm:$0xff] %vm841_vm1, %v888_v24  ;;  %3138 = vmatmul.mubr.msk.bf16.vlgmr.msra.gmra.mrb[16].mxu0 %vm841_vm1, %v1859_v41  ;;  %v2102_v44 = vsel %vm841_vm1, %v1322_v27, 0  ;;  %v3323_v24 = vld [vmem:[#allocation13 + $0x20] sm:$0xff]   ;;  %v3324_v41 = vld [vmem:[#allocation13 + $0x28] sm:$0xff]  }
 0x589   : > { %v880_v46 = vpop.trf.xlu0  ;;  %3142 = vmatpush3.bf16.xpose.msra.mxu1 %v2102_v44  ;;  %3149 = vmatprep.mubr.msk.bf16.mxu0 %vm3680_vm0, %v3679_v15  ;;  %v3326_v44 = vld [vmem:[#allocation13 + $0x38] sm:$0xff]  }
 0x58a   : > { %3153 = vmatprep.subr.bf16.mxu1 %v3679_v15 }
 0x58d   : > { %v881_v53 = vpop.trf.xlu0 }
 0x58e   : > { %v889_v30 = vpack.c.bf16 %v881_v53, %v880_v46 }
 0x58f   : > { %v1323_v33 = vld [vmem:[#allocation3 + $0x30] sm:$0xff] }
 0x590   : > { %897 = vst.msk [vmem:[#allocation3 + $0x38] sm:$0xff] %vm841_vm1, %v889_v30  ;;  %3144 = vmatmul.mubr.msk.bf16.vlgmr.msra.gmra.mrb[44].mxu1 %vm841_vm1, %v1860_v55  ;;  %v2149_v57 = vsel %vm841_vm1, %v1323_v33, 0 }
 0x591   : > { %3148 = vmatpush3.bf16.xpose.msra.mxu0 %v2149_v57  ;;  %3155 = vmatprep.mubr.msk.bf16.mxu1 %vm3680_vm0, %v3679_v15 }
 0x592   : > { %3159 = vmatprep.subr.bf16.mxu0 %v3679_v15 }
 0x597   : > { %v1324_v4 = vld [vmem:[#allocation3 + $0x38] sm:$0xff] }
 0x598   : > { %3150 = vmatmul.mubr.msk.bf16.vlgmr.msra.gmra.mrb[20].mxu0 %vm841_vm1, %v1861_v60  ;;  %v2196_v0 = vsel %vm841_vm1, %v1324_v4, 0 }
 0x599   : > { %3154 = vmatpush3.bf16.xpose.msra.mxu1 %v2196_v0  ;;  %3175 = vmatprep.mubr.msk.bf16.mxu0 %vm3680_vm0, %v3679_v15  ;;  %v2914_v0 = vld [vmem:[%s4492_s14] ss:$0 sm:$0xff]  ;;  %s3575_s14 = scalar_lea.vmem %s3574_s30, 512 }
 0x59a   : > { %3160 = vmatpush3.bf16.msra.mxu0 %v3319_v35  ;;  %p3577_p11 = scmp.lt.s32.totalorder %s3575_s14, %s3569_s18 }
 0x59b   : > { %3161 = vmatprep.subr.bf16.mxu0 %v3679_v15 }
 0x59c   : > { %p3578_p12 = por %p3577_p11, %p3576_p3 }
 0x59e   : > { %3162 = vmatpush3.bf16.msra.mxu0 %v3320_v37  ;;  %p3579_p6 = pnand %p3578_p12, %p3572_p10 }
 0x59f   : > { %3163 = vmatprep.subr.bf16.mxu0 %v3679_v15 }
 0x5a0   : > { %3156 = vmatmul.mubr.msk.bf16.vlgmr.msra.gmra.mrb[48].mxu1 %vm841_vm1, %v1862_v1 }
 0x5a2   : > { %3164 = vmatpush3.bf16.msra.mxu0 %v3321_v29 }
 0x5a3   : > { %3165 = vmatprep.subr.bf16.mxu0 %v3679_v15 }
 0x5a6   : > { %3166 = vmatpush3.bf16.msra.mxu0 %v3322_v38 }
 0x5a7   : > { %3167 = vmatprep.subr.bf16.mxu0 %v3679_v15 }
 0x5aa   : > { %3168 = vmatpush3.bf16.msra.mxu0 %v3323_v24 }
 0x5ab   : > { %3169 = vmatprep.subr.bf16.mxu0 %v3679_v15 }
 0x5ae   : > { %3170 = vmatpush3.bf16.msra.mxu0 %v3324_v41 }
 0x5af   : > { %3171 = vmatprep.subr.bf16.mxu0 %v3679_v15 }
 0x5b2   : > { %3172 = vmatpush3.bf16.msra.mxu0 %v3325_v43 }
 0x5b3   : > { %3173 = vmatprep.subr.bf16.mxu0 %v3679_v15 }
 0x5b6   : > { %3174 = vmatpush3.bf16.msra.mxu0 %v3326_v44 }
 0x63b   : > { %v1903_v6 = vpop.f32.mrb[8].mxu0 }
 0x63c   : > { %2239 = vxpose.xlu1.b32.start [1/2] (short) (narrow) %v1903_v6, 16  ;;  %v3115_v3 = vpop.f32.mrb[9].mxu0  ;;  %v3395_v6 = vld [vmem:[%s4035_s20] sm:$0xff] }
 0x63d   : > { %v1906_v39 = vpop.f32.mrb[10].mxu0 }
 0x63e   : > { %v3116_v63 = vpop.f32.mrb[11].mxu0 }
 0x640   : > { %2240 = vxpose.xlu1.b32.end [2/2] (short) (narrow) %v1906_v39, 16 }
 0x643   : > { %v1950_v2 = vpop.f32.mrb[36].mxu1 }
 0x644   : > { %2271 = vxpose.xlu0.b32.start [1/2] (short) (narrow) %v1950_v2, 16  ;;  %v3121_v5 = vpop.f32.mrb[37].mxu1  ;;  %v3396_v2 = vld [vmem:[%s4035_s20 + $0x8] sm:$0xff]  ;;  %s4494_s20 = sld [smem:[#allocation31_spill]] }
 0x645   : > { %v1953_v42 = vpop.f32.mrb[38].mxu1 }
 0x646   : > { %v3122_v17 = vpop.f32.mrb[39].mxu1 }
 0x648   : > { %2272 = vxpose.xlu0.b32.end [2/2] (short) (narrow) %v1953_v42, 16 }
 0x64b   : > { %v1997_v10 = vpop.f32.mrb[12].mxu0 }
 0x64c   : > { %2303 = vxpose.xlu1.b32.start [1/2] (short) (narrow) %v1997_v10, 16  ;;  %v3127_v9 = vpop.f32.mrb[13].mxu0 }
 0x64d   : > { %v2000_v45 = vpop.f32.mrb[14].mxu0 }
 0x64e   : > { %v3128_v8 = vpop.f32.mrb[15].mxu0 }
 0x650   : > { %2304 = vxpose.xlu1.b32.end [2/2] (short) (narrow) %v2000_v45, 16 }
 0x653   : > { %v2044_v12 = vpop.f32.mrb[40].mxu1 }
 0x654   : > { %2335 = vxpose.xlu1.b32.start [1/2] (short) (narrow) %v2044_v12, 16  ;;  %v3133_v13 = vpop.f32.mrb[41].mxu1 }
 0x655   : > { %v2047_v11 = vpop.f32.mrb[42].mxu1 }
 0x656   : > { %v3134_v16 = vpop.f32.mrb[43].mxu1 }
 0x658   : > { %2336 = vxpose.xlu1.b32.end [2/2] (short) (narrow) %v2047_v11, 16 }
 0x65b   : > { %v2091_v19 = vpop.f32.mrb[16].mxu0 }
 0x65c   : > { %2367 = vxpose.xlu1.b32.start [1/2] (short) (narrow) %v2091_v19, 16  ;;  %v3139_v20 = vpop.f32.mrb[17].mxu0 }
 0x65d   : > { %v2094_v14 = vpop.f32.mrb[18].mxu0 }
 0x65e   : > { %v3140_v26 = vpop.f32.mrb[19].mxu0 }
 0x660   : > { %2368 = vxpose.xlu1.b32.end [2/2] (short) (narrow) %v2094_v14, 16 }
 0x663   : > { %v2138_v22 = vpop.f32.mrb[44].mxu1 }
 0x664   : > { %2399 = vxpose.xlu1.b32.start [1/2] (short) (narrow) %v2138_v22, 16  ;;  %v3145_v23 = vpop.f32.mrb[45].mxu1 }
 0x665   : > { %v2141_v25 = vpop.f32.mrb[46].mxu1  ;;  %v2923_v23 = vld [vmem:[%s4494_s20] ss:$0 sm:$0xff] }
 0x666   : > { %v3146_v18 = vpop.f32.mrb[47].mxu1 }
 0x667   : > { %v2924_v18 = vld [vmem:[%s4495_s13] ss:$0 sm:$0xff] }
 0x668   : > { %2400 = vxpose.xlu1.b32.end [2/2] (short) (narrow) %v2141_v25, 16 }
 0x66b   : > { %v2185_v28 = vpop.f32.mrb[20].mxu0 }
 0x66c   : > { %2431 = vxpose.xlu1.b32.start [1/2] (short) (narrow) %v2185_v28, 16  ;;  %v3151_v52 = vpop.f32.mrb[21].mxu0 }
 0x66d   : > { %v2188_v31 = vpop.f32.mrb[22].mxu0 }
 0x66e   : > { %v3152_v47 = vpop.f32.mrb[23].mxu0 }
 0x670   : > { %2432 = vxpose.xlu1.b32.end [2/2] (short) (narrow) %v2188_v31, 16 }
 0x673   : > { %v2232_v32 = vpop.f32.mrb[48].mxu1 }
 0x674   : > { %2463 = vxpose.xlu1.b32.start [1/2] (short) (narrow) %v2232_v32, 16  ;;  %v3157_v50 = vpop.f32.mrb[49].mxu1 }
 0x675   : > { %v2235_v40 = vpop.f32.mrb[50].mxu1 }
 0x676   : > { %v3158_v34 = vpop.f32.mrb[51].mxu1 }
 0x678   : > { %2464 = vxpose.xlu1.b32.end [2/2] (short) (narrow) %v2235_v40, 16 }
 0x6bc   : > { %v2255_v27 = vpop.trf.xlu1 }
 0x6bd   : > { %2495 = vxpose.xlu1.b32.start [1/16] (narrow) %v2255_v27, 16 }
 0x6c0   : > { %v2256_v54 = vpop.trf.xlu1 }
 0x6c1   : > { %2496 = vxpose.xlu1.b32.cont [2/16] (narrow) %v2256_v54, 16 }
 0x6c4   : > { %v2287_v46 = vpop.trf.xlu0 }
 0x6c5   : > { %2497 = vxpose.xlu1.b32.cont [3/16] (narrow) %v2287_v46, 16 }
 0x6c8   : > { %v2288_v49 = vpop.trf.xlu0 }
 0x6c9   : > { %2498 = vxpose.xlu1.b32.cont [4/16] (narrow) %v2288_v49, 16 }
 0x6cc   : > { %v2319_v51 = vpop.trf.xlu1 }
 0x6cd   : > { %2499 = vxpose.xlu1.b32.cont [5/16] (narrow) %v2319_v51, 16 }
 0x6d0   : > { %v2320_v21 = vpop.trf.xlu1 }
 0x6d1   : > { %2500 = vxpose.xlu1.b32.cont [6/16] (narrow) %v2320_v21, 16 }
 0x6d4   : > { %v2351_v53 = vpop.trf.xlu1 }
 0x6d5   : > { %2501 = vxpose.xlu1.b32.cont [7/16] (narrow) %v2351_v53, 16 }
 0x6d8   : > { %v2352_v30 = vpop.trf.xlu1 }
 0x6d9   : > { %2502 = vxpose.xlu1.b32.cont [8/16] (narrow) %v2352_v30, 16 }
 0x6dc   : > { %v2383_v55 = vpop.trf.xlu1 }
 0x6dd   : > { %2503 = vxpose.xlu1.b32.cont [9/16] (narrow) %v2383_v55, 16 }
 0x6e0   : > { %v2384_v15 = vpop.trf.xlu1 }
 0x6e1   : > { %2504 = vxpose.xlu1.b32.cont [10/16] (narrow) %v2384_v15, 16 }
 0x6e4   : > { %v2415_v56 = vpop.trf.xlu1 }
 0x6e5   : > { %2505 = vxpose.xlu1.b32.cont [11/16] (narrow) %v2415_v56, 16 }
 0x6e8   : > { %v2416_v33 = vpop.trf.xlu1 }
 0x6e9   : > { %2506 = vxpose.xlu1.b32.cont [12/16] (narrow) %v2416_v33, 16 }
 0x6ec   : > { %v2447_v57 = vpop.trf.xlu1 }
 0x6ed   : > { %2507 = vxpose.xlu1.b32.cont [13/16] (narrow) %v2447_v57, 16 }
 0x6f0   : > { %v2448_v62 = vpop.trf.xlu1 }
 0x6f1   : > { %2508 = vxpose.xlu1.b32.cont [14/16] (narrow) %v2448_v62, 16 }
 0x6f4   : > { %v2479_v59 = vpop.trf.xlu1 }
 0x6f5   : > { %2509 = vxpose.xlu1.b32.cont [15/16] (narrow) %v2479_v59, 16 }
 0x6f8   : > { %v2480_v58 = vpop.trf.xlu1 }
 0x6f9   : > { %2510 = vxpose.xlu1.b32.end [16/16] (narrow) %v2480_v58, 16 }
 0x73d   : > { %v2511_v60 = vpop.trf.xlu1 }
 0x741   : > { %v2512_v48 = vpop.trf.xlu1 }
 0x742   : > { %v2527_v4 = vpack.c.bf16 %v2512_v48, %v2511_v60 }
 0x744   : > { %3176 = vmatmul.mubr.bf16.vlgmr.msra.gmra.mrb[24].mxu0 %v2527_v4 }
 0x817   : > { %v2633_v61 = vpop.f32.mrb[24].mxu0 }
 0x818   : > { %v2634_v36 = vadd.f32 %v2914_v0, %v2633_v61  ;;  %v3177_v7 = vpop.f32.mrb[25].mxu0 }
 0x819   : > { %v2636_v1 = vpop.f32.mrb[26].mxu0 }
 0x81a   : > { %v2640_v3 = vadd.f32 %v3395_v6, %v2634_v36  ;;  %v2637_v39 = vadd.f32 %v2914_v0, %v2636_v1  ;;  %v3178_v63 = vpop.f32.mrb[27].mxu0 }
 0x81c   : > { %2642 = vadd.xlane.f32.xlu0 %v2640_v3  ;;  %v2641_v5 = vadd.f32 %v3396_v2, %v2637_v39 }
 0x820   : > { %2644 = vadd.xlane.f32.xlu0 %v2641_v5 }
 0x8a9   : > { %v2643_v42 = vpop.xlane.xlu0 %2642 }
 0x8aa   : > { %v2647_v17 = vmul.f32 0.0078125, %v2643_v42 }
 0x8ac   : > { %v2649_v10 = vsub.f32 %v2640_v3, %v2647_v17 }
 0x8ad   : > { %v2645_v9 = vpop.xlane.xlu0 %2644 }
 0x8ae   : > { %v2648_v45 = vmul.f32 0.0078125, %v2645_v9  ;;  %v2651_v8 = vmul.f32 %v2649_v10, %v2649_v10 }
 0x8b0   : > { %v2650_v12 = vsub.f32 %v2641_v5, %v2648_v45  ;;  %2653 = vadd.xlane.f32.xlu0 %v2651_v8 }
 0x8b2   : > { %v2652_v13 = vmul.f32 %v2650_v12, %v2650_v12 }
 0x8b4   : > { %2655 = vadd.xlane.f32.xlu0 %v2652_v13 }
 0x93d   : > { %v2654_v11 = vpop.xlane.xlu0 %2653 }
 0x93e   : > { %v2657_v16 = vmul.f32 0.0078125, %v2654_v11 }
 0x940   : > { %v2659_v19 = vadd.f32 1e-05, %v2657_v16 }
 0x941   : > { %v2656_v20 = vpop.xlane.xlu0 %2655 }
 0x942   : > { %3391 = vrsqrt.f32 %v2659_v19  ;;  %v2658_v14 = vmul.f32 0.0078125, %v2656_v20 }
 0x944   : > { %v2660_v26 = vadd.f32 1e-05, %v2658_v14 }
 0x946   : > { %3393 = vrsqrt.f32 %v2660_v26 }
 0x94c   : > { %v3392_v22 = vpop.eup %3391 }
 0x94d   : > { %v2663_v25 = vmul.f32 %v3392_v22, %v2649_v10 }
 0x94f   : > { %v2672_v28 = vmul.f32 %v2923_v23, %v2663_v25 }
 0x950   : > { %v3394_v52 = vpop.eup %3393 }
 0x951   : > { %v2681_v31 = vadd.f32 %v2924_v18, %v2672_v28  ;;  %v2664_v47 = vmul.f32 %v3394_v52, %v2650_v12 }
 0x953   : > { %v2673_v32 = vmul.f32 %v2923_v23, %v2664_v47  ;;  %2683 = vst [vmem:[%s547_s27] sm:$0xff] %v2681_v31 }
 0x955   : > { %v2682_v50 = vadd.f32 %v2924_v18, %v2673_v32 }
 0x957   : > { %2684 = vst [vmem:[%s547_s27 + $0x8] sm:$0xff] %v2682_v50 }
 0x958   : > { %3582 = shalt.err (!%p3579_p6)
}
 0x959   : > { %s3583_s17 = scalar_lea.hbm %s4389_s0, 256  ;;  %s3587_s20 = scalar_lea.hbm %s4496_s19, 512 }
 0x95a   : > { %p3584_p7 = scmp.ne.s32.totalorder %s4389_s0, %s3583_s17  ;;  %p3588_p2 = scmp.lt.u32.totalorder %s4389_s0, %s4496_s19 }
 0x95b   : > { %p3589_p13 = scmp.lt.u32.totalorder %s3587_s20, %s3583_s17  ;;  %p3591_p1 = scmp.lt.u32.totalorder %s3583_s17, %s4389_s0 }
 0x95c   : > { %p3585_p9 = pnand %p3584_p7, %p3929_p5 }
 0x95d   : > { %p3590_p4 = por %p3589_p13, %p3588_p2 }
 0x95e   : > { %p3586_p0 = pneg %p3585_p9 }
 0x95f   : > { %p3592_p8 = por %p3591_p1, %p3590_p4 }
 0x961   : > { %p3593_p10 = pnand %p3592_p8, %p3586_p0 }
 0x963   : > { %3596 = shalt.err (!%p3593_p10)
}
 0x964   : > { %s3682_s13 = smov 128   ;;  %s3683_s8 = smov 8  }
 0x965   : > { %3199 = dma.vmem_to_hbm [thread:$0]  (%p3929_p5), %s4391_s29, 256, %s4389_s0, %s2686_s15, %s3682_s13, %s3682_s13, %s3683_s8  }
 0x966 PF: > { %s4497_s27 = sld [smem:[#allocation22_spill]]  ;;  %s4498_s21 = sld [smem:[#allocation24_spill]] }
 0x967   : > { %p4500_p11 = scmp.ge.s32.totalorder %s3667_s26, 2 }
 0x96c   : > { %s2716_s16 = sand.u32 1, %s4497_s27   ;;  %p4499_p3 = scmp.ne.s32.totalorder %s4498_s21, 0 }
 0x96d   : > { %s2717_s18 = scalar_lea.sflag [#allocation6], %s2716_s16 }
 0x96e   : > { %p3222_p12 = pnand %p4500_p11, %p4499_p3 }
 0x970   : > { %3642 = dma.done.wait (!%p3222_p12), %s2717_s18, 256  }
 0x971   : > { %3644 = vsyncadd (!%p3222_p12), %s2717_s18, 4294967040  ;;  %s33_s26 = sadd.s32 1, %s3667_s26   ;;  %s4501_s21 = smov %s3651_s22 }
 0x972   : > { %p30_p6 = scmp.ge.s32.totalorder %s33_s26, 4   ;;  %s4502_s22 = smov %s3655_s23 }
 0x973   : > { %s4503_s23 = smov %s3941_s10  ;;  %s4504_s24 = smov %s3663_s25 }
 0x974   : > { %s4505_s25 = smov %s4507_s11  ;;  %32 = sbr.rel (!%p30_p6) target bundleno = 20 (0x14), region = 146 }
 0x97b   :  { %2722 = vsyncpa [#allocation5], 1 }
 0x97c   :  { %2724 = vsyncpa [#allocation5 + $0x1], 1 }
 0x97d   :  { %2725 = vsyncpa [#allocation8], 1 }
 0x97e   :  { %2727 = vsyncpa [#allocation8 + $0x1], 1 }
 0x97f   :  { %2728 = vsyncpa [#allocation11], 1 }
 0x980   :  { %2729 = vsyncpa [#allocation14], 1 }
 0x981   :  { %2730 = vsyncpa [#allocation6], 1 }
 0x982   :  { %2732 = vsyncpa [#allocation6 + $0x1], 1 }

</bundles_post_ra>
